<compile_context>
chip_gen: v5e
topology: v5e:2x2
jax: 0.10.0
libtpu: 0.0.40
codegen_flags: <defaults>
</compile_context>

<pallas_src>
import jax
import jax.numpy as jnp
from jax.experimental import pallas as pl
from jax.experimental.pallas import tpu as pltpu


def _char_lstm_kernel(tok_ref,                 # SMEM (B, T) int32   [scalar prefetch]
                      h0_ref, c0_ref,          # (B, H)
                      emb_ref,                 # (V, E)
                      w_ih_ref,                # (E, 4H)
                      w_hh_ref,                # (H, 4H)
                      b_ref,                   # (1, 4H)   (b_ih + b_hh)
                      w_fc_ref,                # (H, V)
                      b_fc_ref,                # (1, V)
                      out_ref,                 # (T*B, V)  time-major flat
                      hn_ref, cn_ref,          # (B, H)
                      g_sc,                    # (V, 4H)   fused emb @ W_ih + b table
                      xg_sc,                   # (T*B, 4H) gathered gate contributions
                      hseq_sc):                # (T*B, H)  h_t accumulator
    B, H = h0_ref.shape
    V = emb_ref.shape[0]
    TB = xg_sc.shape[0]
    T = TB // B

    # (1) Fold the embedding into the input projection (one small MXU pass, off-chain):
    #     G[v, :] = embedding[v, :] @ W_ih + (b_ih + b_hh)
    g_sc[...] = (jnp.dot(emb_ref[...], w_ih_ref[...],
                         preferred_element_type=jnp.float32)
                 + b_ref[...])                                   # (V, 4H)

    # (2) Fused "embedding lookup": gather pre-projected 128-lane gate rows by token id
    #     read from SMEM.  Static destinations, dynamic (token-indexed) sources.
    for t in range(T):
        for bi in range(B):
            tok = tok_ref[bi, t]                                 # SMEM scalar read
            xg_sc[pl.ds(t * B + bi, 1), :] = g_sc[pl.ds(tok, 1), :]

    w_hh = w_hh_ref[...]                                         # hoist weight load

    # (3) Serial recurrence, fully unrolled with static indices.
    h = h0_ref[...]
    c = c0_ref[...]
    for t in range(T):
        gates = xg_sc[pl.ds(t * B, B), :] + jnp.dot(
            h, w_hh, preferred_element_type=jnp.float32)         # (B, 4H), order i|f|g|o
        # Full 128-lane EUP passes; gate extraction is cheap static lane slicing.
        sig = jax.nn.sigmoid(gates)
        tnh = jnp.tanh(gates)
        i_g = sig[:, 0:H]
        f_g = sig[:, H:2 * H]
        g_g = tnh[:, 2 * H:3 * H]
        o_g = sig[:, 3 * H:4 * H]
        c = f_g * c + i_g * g_g
        h = o_g * jnp.tanh(c)
        hseq_sc[pl.ds(t * B, B), :] = h                          # static slice store

    # (4) Final state written once.
    hn_ref[...] = h
    cn_ref[...] = c

    # (5) One batched FC projection + single output store.
    #     (out last dim V=32 < 128 lanes -> masked stores; negligible at this size.)
    out_ref[...] = (jnp.dot(hseq_sc[...], w_fc_ref[...],
                            preferred_element_type=jnp.float32)
                    + b_fc_ref[...])


def char_lstm_forward(tokens, params, hidden=None):
    """Equivalent of CharLSTM.forward(x, hidden) for num_layers=1 (batch_first=True)."""
    emb = params["embedding"].astype(jnp.float32)   # (V, E)
    w_ih = params["w_ih"]                           # (E, 4H)
    w_hh = params["w_hh"]                           # (H, 4H)
    b = params["b"]                                 # (1, 4H) = b_ih + b_hh
    w_fc = params["w_fc"]                           # (H, V)
    b_fc = params["b_fc"]                           # (1, V)

    B, T = tokens.shape
    V, E = emb.shape
    H = w_hh.shape[0]

    if hidden is None:
        h0 = jnp.zeros((B, H), jnp.float32)
        c0 = jnp.zeros((B, H), jnp.float32)
    else:
        h0_in, c0_in = hidden
        h0 = h0_in[0].astype(jnp.float32)
        c0 = c0_in[0].astype(jnp.float32)

    grid_spec = pltpu.PrefetchScalarGridSpec(
        num_scalar_prefetch=1,                       # tokens -> SMEM
        grid=(1,),
        in_specs=[
            pl.BlockSpec((B, H), lambda i, tok: (0, 0)),       # h0
            pl.BlockSpec((B, H), lambda i, tok: (0, 0)),       # c0
            pl.BlockSpec((V, E), lambda i, tok: (0, 0)),       # embedding table
            pl.BlockSpec((E, 4 * H), lambda i, tok: (0, 0)),   # W_ih
            pl.BlockSpec((H, 4 * H), lambda i, tok: (0, 0)),   # W_hh
            pl.BlockSpec((1, 4 * H), lambda i, tok: (0, 0)),   # b
            pl.BlockSpec((H, V), lambda i, tok: (0, 0)),       # W_fc
            pl.BlockSpec((1, V), lambda i, tok: (0, 0)),       # b_fc
        ],
        out_specs=[
            pl.BlockSpec((T * B, V), lambda i, tok: (0, 0)),   # out (time-major flat)
            pl.BlockSpec((B, H), lambda i, tok: (0, 0)),       # hn
            pl.BlockSpec((B, H), lambda i, tok: (0, 0)),       # cn
        ],
        scratch_shapes=[
            pltpu.VMEM((V, 4 * H), jnp.float32),               # G = emb @ W_ih + b
            pltpu.VMEM((T * B, 4 * H), jnp.float32),           # gathered gate rows
            pltpu.VMEM((T * B, H), jnp.float32),               # h sequence accumulator
        ],
    )

    out_flat, hn, cn = pl.pallas_call(
        _char_lstm_kernel,
        out_shape=(
            jax.ShapeDtypeStruct((T * B, V), jnp.float32),
            jax.ShapeDtypeStruct((B, H), jnp.float32),
            jax.ShapeDtypeStruct((B, H), jnp.float32),
        ),
        grid_spec=grid_spec,
        compiler_params=pltpu.CompilerParams(
            dimension_semantics=("arbitrary",),
        ),
    )(tokens.astype(jnp.int32), h0, c0, emb, w_ih, w_hh, b, w_fc, b_fc)

    out = jnp.transpose(out_flat.reshape(T, B, V), (1, 0, 2))   # (B, T, V) batch_first
    return out, (hn[None, ...], cn[None, ...])                  # (1, B, H) each


def _ref_forward(tokens, params):
    """Pure-JAX reference (lax.scan LSTM) for correctness checking."""
    emb = jnp.take(params["embedding"], tokens, axis=0)          # (B, T, E)
    x_tbe = jnp.transpose(emb, (1, 0, 2)).astype(jnp.float32)
    B = tokens.shape[0]
    H = params["w_hh"].shape[0]
    h0 = jnp.zeros((B, H), jnp.float32)
    c0 = jnp.zeros((B, H), jnp.float32)

    def step(carry, x_t):
        h, c = carry
        gates = x_t @ params["w_ih"] + h @ params["w_hh"] + params["b"][0]
        i = jax.nn.sigmoid(gates[:, 0:H])
        f = jax.nn.sigmoid(gates[:, H:2 * H])
        g = jnp.tanh(gates[:, 2 * H:3 * H])
        o = jax.nn.sigmoid(gates[:, 3 * H:4 * H])
        c_new = f * c + i * g
        h_new = o * jnp.tanh(c_new)
        return (h_new, c_new), h_new

    (hn, cn), h_seq = jax.lax.scan(step, (h0, c0), x_tbe)
    out = h_seq @ params["w_fc"] + params["b_fc"][0]             # (T, B, V)
    return jnp.transpose(out, (1, 0, 2)), (hn[None], cn[None])


def init_params(key, vocab_size, embedding_dim, hidden_dim):
    keys = jax.random.split(key, 7)
    scale = 1.0 / jnp.sqrt(hidden_dim)
    return {
        "embedding": jax.random.normal(keys[0], (vocab_size, embedding_dim), jnp.float32),
        "w_ih": jax.random.uniform(keys[1], (embedding_dim, 4 * hidden_dim),
                                   jnp.float32, -scale, scale),
        "w_hh": jax.random.uniform(keys[2], (hidden_dim, 4 * hidden_dim),
                                   jnp.float32, -scale, scale),
        "b": jax.random.uniform(keys[3], (1, 4 * hidden_dim), jnp.float32, -scale, scale),
        "w_fc": jax.random.uniform(keys[4], (hidden_dim, vocab_size),
                                   jnp.float32, -scale, scale),
        "b_fc": jax.random.uniform(keys[5], (1, vocab_size), jnp.float32, -scale, scale),
    }


if __name__ == "__main__":
    vocab_size, embedding_dim, hidden_dim = 32, 16, 32
    batch, seq = 2, 8

    key = jax.random.PRNGKey(0)
    k_params, k_tok = jax.random.split(key)
    params = init_params(k_params, vocab_size, embedding_dim, hidden_dim)
    tokens = jax.random.randint(k_tok, (batch, seq), 0, vocab_size, dtype=jnp.int32)

    out, (hn, cn) = char_lstm_forward(tokens, params)
    jax.block_until_ready((out, hn, cn))

    out_ref, (hn_ref, cn_ref) = _ref_forward(tokens, params)
    assert out.shape == (batch, seq, vocab_size)
    assert hn.shape == (1, batch, hidden_dim) and cn.shape == (1, batch, hidden_dim)
    assert jnp.allclose(out, out_ref, atol=2e-5, rtol=2e-5)
    assert jnp.allclose(hn, hn_ref, atol=2e-5, rtol=2e-5)
    assert jnp.allclose(cn, cn_ref, atol=2e-5, rtol=2e-5)

    print("KERNEL_OK")
</pallas_src>

<mosaic_0001>
module attributes {stable_mosaic.version = 11 : i64} {
  func.func @_char_lstm_kernel(%arg0: i32, %arg1: memref<2x8xi32, #tpu.memory_space<smem>>, %arg2: memref<2x32xf32, #tpu.memory_space<vmem>>, %arg3: memref<2x32xf32, #tpu.memory_space<vmem>>, %arg4: memref<32x16xf32, #tpu.memory_space<vmem>>, %arg5: memref<16x128xf32, #tpu.memory_space<vmem>>, %arg6: memref<32x128xf32, #tpu.memory_space<vmem>>, %arg7: memref<1x128xf32, #tpu.memory_space<vmem>>, %arg8: memref<32x32xf32, #tpu.memory_space<vmem>>, %arg9: memref<1x32xf32, #tpu.memory_space<vmem>>, %arg10: memref<16x32xf32, #tpu.memory_space<vmem>>, %arg11: memref<2x32xf32, #tpu.memory_space<vmem>>, %arg12: memref<2x32xf32, #tpu.memory_space<vmem>>, %arg13: memref<32x128xf32, #tpu.memory_space<vmem>>, %arg14: memref<16x128xf32, #tpu.memory_space<vmem>>, %arg15: memref<16x32xf32, #tpu.memory_space<vmem>>) attributes {dimension_semantics = [#tpu.dimension_semantics<arbitrary>], iteration_bounds = array<i64: 1>, scalar_prefetch = 1 : i64, scratch_operands = 3 : i64, tpu.core_type = #tpu.core_type<tc>, window_params = [{pipeline_mode = #tpu.pipeline_mode<synchronous>, transform_indices = @transform_0, window_bounds = array<i64: 2, 32>}, {pipeline_mode = #tpu.pipeline_mode<synchronous>, transform_indices = @transform_1, window_bounds = array<i64: 2, 32>}, {pipeline_mode = #tpu.pipeline_mode<synchronous>, transform_indices = @transform_2, window_bounds = array<i64: 32, 16>}, {pipeline_mode = #tpu.pipeline_mode<synchronous>, transform_indices = @transform_3, window_bounds = array<i64: 16, 128>}, {pipeline_mode = #tpu.pipeline_mode<synchronous>, transform_indices = @transform_4, window_bounds = array<i64: 32, 128>}, {pipeline_mode = #tpu.pipeline_mode<synchronous>, transform_indices = @transform_5, window_bounds = array<i64: 1, 128>}, {pipeline_mode = #tpu.pipeline_mode<synchronous>, transform_indices = @transform_6, window_bounds = array<i64: 32, 32>}, {pipeline_mode = #tpu.pipeline_mode<synchronous>, transform_indices = @transform_7, window_bounds = array<i64: 1, 32>}, {pipeline_mode = #tpu.pipeline_mode<synchronous>, transform_indices = @transform_8, window_bounds = array<i64: 16, 32>}, {pipeline_mode = #tpu.pipeline_mode<synchronous>, transform_indices = @transform_9, window_bounds = array<i64: 2, 32>}, {pipeline_mode = #tpu.pipeline_mode<synchronous>, transform_indices = @transform_10, window_bounds = array<i64: 2, 32>}]} {
    %c0 = arith.constant 0 : index
    %c0_0 = arith.constant 0 : index
    %0 = vector.load %arg4[%c0, %c0_0] : memref<32x16xf32, #tpu.memory_space<vmem>>, vector<32x16xf32>
    %c0_1 = arith.constant 0 : index
    %c0_2 = arith.constant 0 : index
    %1 = vector.load %arg5[%c0_1, %c0_2] : memref<16x128xf32, #tpu.memory_space<vmem>>, vector<16x128xf32>
    %cst = arith.constant dense<0.000000e+00> : vector<32x128xf32>
    %2 = tpu.matmul %0, %1, %cst {dimension_numbers = #tpu.dot_dimension_numbers<[1], [0], [0], [1], [0, 0, 1, 1], [], []>} : vector<32x16xf32>, vector<16x128xf32>, vector<32x128xf32> -> vector<32x128xf32>
    %c0_3 = arith.constant 0 : index
    %c0_4 = arith.constant 0 : index
    %3 = vector.load %arg7[%c0_3, %c0_4] : memref<1x128xf32, #tpu.memory_space<vmem>>, vector<1x128xf32>
    %4 = vector.broadcast %3 : vector<1x128xf32> to vector<32x128xf32>
    %5 = arith.addf %2, %4 : vector<32x128xf32>
    %c0_5 = arith.constant 0 : index
    %c0_6 = arith.constant 0 : index
    %6 = vector.load %arg13[%c0_5, %c0_6] : memref<32x128xf32, #tpu.memory_space<vmem>>, vector<32x128xf32>
    tpu.vector_store %arg13[%c0_5, %c0_6], %5 {strides = array<i32>} : memref<32x128xf32, #tpu.memory_space<vmem>>, vector<32x128xf32>,
    %c0_7 = arith.constant 0 : index
    %c0_8 = arith.constant 0 : index
    %7 = memref.load %arg1[%c0_7, %c0_8] : memref<2x8xi32, #tpu.memory_space<smem>>
    %8 = arith.index_cast %7 : i32 to index
    %c0_9 = arith.constant 0 : index
    %9 = vector.load %arg13[%8, %c0_9] : memref<32x128xf32, #tpu.memory_space<vmem>>, vector<1x128xf32>
    %c0_10 = arith.constant 0 : index
    %c0_11 = arith.constant 0 : index
    %10 = vector.load %arg14[%c0_10, %c0_11] : memref<16x128xf32, #tpu.memory_space<vmem>>, vector<1x128xf32>
    tpu.vector_store %arg14[%c0_10, %c0_11], %9 {strides = array<i32>} : memref<16x128xf32, #tpu.memory_space<vmem>>, vector<1x128xf32>,
    %c1 = arith.constant 1 : index
    %c0_12 = arith.constant 0 : index
    %11 = memref.load %arg1[%c1, %c0_12] : memref<2x8xi32, #tpu.memory_space<smem>>
    %12 = arith.index_cast %11 : i32 to index
    %c0_13 = arith.constant 0 : index
    %13 = vector.load %arg13[%12, %c0_13] : memref<32x128xf32, #tpu.memory_space<vmem>>, vector<1x128xf32>
    %c1_14 = arith.constant 1 : index
    %c0_15 = arith.constant 0 : index
    %14 = vector.load %arg14[%c1_14, %c0_15] : memref<16x128xf32, #tpu.memory_space<vmem>>, vector<1x128xf32>
    tpu.vector_store %arg14[%c1_14, %c0_15], %13 {strides = array<i32>} : memref<16x128xf32, #tpu.memory_space<vmem>>, vector<1x128xf32>,
    %c0_16 = arith.constant 0 : index
    %c1_17 = arith.constant 1 : index
    %15 = memref.load %arg1[%c0_16, %c1_17] : memref<2x8xi32, #tpu.memory_space<smem>>
    %16 = arith.index_cast %15 : i32 to index
    %c0_18 = arith.constant 0 : index
    %17 = vector.load %arg13[%16, %c0_18] : memref<32x128xf32, #tpu.memory_space<vmem>>, vector<1x128xf32>
    %c2 = arith.constant 2 : index
    %c0_19 = arith.constant 0 : index
    %18 = vector.load %arg14[%c2, %c0_19] : memref<16x128xf32, #tpu.memory_space<vmem>>, vector<1x128xf32>
    tpu.vector_store %arg14[%c2, %c0_19], %17 {strides = array<i32>} : memref<16x128xf32, #tpu.memory_space<vmem>>, vector<1x128xf32>,
    %c1_20 = arith.constant 1 : index
    %c1_21 = arith.constant 1 : index
    %19 = memref.load %arg1[%c1_20, %c1_21] : memref<2x8xi32, #tpu.memory_space<smem>>
    %20 = arith.index_cast %19 : i32 to index
    %c0_22 = arith.constant 0 : index
    %21 = vector.load %arg13[%20, %c0_22] : memref<32x128xf32, #tpu.memory_space<vmem>>, vector<1x128xf32>
    %c3 = arith.constant 3 : index
    %c0_23 = arith.constant 0 : index
    %22 = vector.load %arg14[%c3, %c0_23] : memref<16x128xf32, #tpu.memory_space<vmem>>, vector<1x128xf32>
    tpu.vector_store %arg14[%c3, %c0_23], %21 {strides = array<i32>} : memref<16x128xf32, #tpu.memory_space<vmem>>, vector<1x128xf32>,
    %c0_24 = arith.constant 0 : index
    %c2_25 = arith.constant 2 : index
    %23 = memref.load %arg1[%c0_24, %c2_25] : memref<2x8xi32, #tpu.memory_space<smem>>
    %24 = arith.index_cast %23 : i32 to index
    %c0_26 = arith.constant 0 : index
    %25 = vector.load %arg13[%24, %c0_26] : memref<32x128xf32, #tpu.memory_space<vmem>>, vector<1x128xf32>
    %c4 = arith.constant 4 : index
    %c0_27 = arith.constant 0 : index
    %26 = vector.load %arg14[%c4, %c0_27] : memref<16x128xf32, #tpu.memory_space<vmem>>, vector<1x128xf32>
    tpu.vector_store %arg14[%c4, %c0_27], %25 {strides = array<i32>} : memref<16x128xf32, #tpu.memory_space<vmem>>, vector<1x128xf32>,
    %c1_28 = arith.constant 1 : index
    %c2_29 = arith.constant 2 : index
    %27 = memref.load %arg1[%c1_28, %c2_29] : memref<2x8xi32, #tpu.memory_space<smem>>
    %28 = arith.index_cast %27 : i32 to index
    %c0_30 = arith.constant 0 : index
    %29 = vector.load %arg13[%28, %c0_30] : memref<32x128xf32, #tpu.memory_space<vmem>>, vector<1x128xf32>
    %c5 = arith.constant 5 : index
    %c0_31 = arith.constant 0 : index
    %30 = vector.load %arg14[%c5, %c0_31] : memref<16x128xf32, #tpu.memory_space<vmem>>, vector<1x128xf32>
    tpu.vector_store %arg14[%c5, %c0_31], %29 {strides = array<i32>} : memref<16x128xf32, #tpu.memory_space<vmem>>, vector<1x128xf32>,
    %c0_32 = arith.constant 0 : index
    %c3_33 = arith.constant 3 : index
    %31 = memref.load %arg1[%c0_32, %c3_33] : memref<2x8xi32, #tpu.memory_space<smem>>
    %32 = arith.index_cast %31 : i32 to index
    %c0_34 = arith.constant 0 : index
    %33 = vector.load %arg13[%32, %c0_34] : memref<32x128xf32, #tpu.memory_space<vmem>>, vector<1x128xf32>
    %c6 = arith.constant 6 : index
    %c0_35 = arith.constant 0 : index
    %34 = vector.load %arg14[%c6, %c0_35] : memref<16x128xf32, #tpu.memory_space<vmem>>, vector<1x128xf32>
    tpu.vector_store %arg14[%c6, %c0_35], %33 {strides = array<i32>} : memref<16x128xf32, #tpu.memory_space<vmem>>, vector<1x128xf32>,
    %c1_36 = arith.constant 1 : index
    %c3_37 = arith.constant 3 : index
    %35 = memref.load %arg1[%c1_36, %c3_37] : memref<2x8xi32, #tpu.memory_space<smem>>
    %36 = arith.index_cast %35 : i32 to index
    %c0_38 = arith.constant 0 : index
    %37 = vector.load %arg13[%36, %c0_38] : memref<32x128xf32, #tpu.memory_space<vmem>>, vector<1x128xf32>
    %c7 = arith.constant 7 : index
    %c0_39 = arith.constant 0 : index
    %38 = vector.load %arg14[%c7, %c0_39] : memref<16x128xf32, #tpu.memory_space<vmem>>, vector<1x128xf32>
    tpu.vector_store %arg14[%c7, %c0_39], %37 {strides = array<i32>} : memref<16x128xf32, #tpu.memory_space<vmem>>, vector<1x128xf32>,
    %c0_40 = arith.constant 0 : index
    %c4_41 = arith.constant 4 : index
    %39 = memref.load %arg1[%c0_40, %c4_41] : memref<2x8xi32, #tpu.memory_space<smem>>
    %40 = arith.index_cast %39 : i32 to index
    %c0_42 = arith.constant 0 : index
    %41 = vector.load %arg13[%40, %c0_42] : memref<32x128xf32, #tpu.memory_space<vmem>>, vector<1x128xf32>
    %c8 = arith.constant 8 : index
    %c0_43 = arith.constant 0 : index
    %42 = vector.load %arg14[%c8, %c0_43] : memref<16x128xf32, #tpu.memory_space<vmem>>, vector<1x128xf32>
    tpu.vector_store %arg14[%c8, %c0_43], %41 {strides = array<i32>} : memref<16x128xf32, #tpu.memory_space<vmem>>, vector<1x128xf32>,
    %c1_44 = arith.constant 1 : index
    %c4_45 = arith.constant 4 : index
    %43 = memref.load %arg1[%c1_44, %c4_45] : memref<2x8xi32, #tpu.memory_space<smem>>
    %44 = arith.index_cast %43 : i32 to index
    %c0_46 = arith.constant 0 : index
    %45 = vector.load %arg13[%44, %c0_46] : memref<32x128xf32, #tpu.memory_space<vmem>>, vector<1x128xf32>
    %c9 = arith.constant 9 : index
    %c0_47 = arith.constant 0 : index
    %46 = vector.load %arg14[%c9, %c0_47] : memref<16x128xf32, #tpu.memory_space<vmem>>, vector<1x128xf32>
    tpu.vector_store %arg14[%c9, %c0_47], %45 {strides = array<i32>} : memref<16x128xf32, #tpu.memory_space<vmem>>, vector<1x128xf32>,
    %c0_48 = arith.constant 0 : index
    %c5_49 = arith.constant 5 : index
    %47 = memref.load %arg1[%c0_48, %c5_49] : memref<2x8xi32, #tpu.memory_space<smem>>
    %48 = arith.index_cast %47 : i32 to index
    %c0_50 = arith.constant 0 : index
    %49 = vector.load %arg13[%48, %c0_50] : memref<32x128xf32, #tpu.memory_space<vmem>>, vector<1x128xf32>
    %c10 = arith.constant 10 : index
    %c0_51 = arith.constant 0 : index
    %50 = vector.load %arg14[%c10, %c0_51] : memref<16x128xf32, #tpu.memory_space<vmem>>, vector<1x128xf32>
    tpu.vector_store %arg14[%c10, %c0_51], %49 {strides = array<i32>} : memref<16x128xf32, #tpu.memory_space<vmem>>, vector<1x128xf32>,
    %c1_52 = arith.constant 1 : index
    %c5_53 = arith.constant 5 : index
    %51 = memref.load %arg1[%c1_52, %c5_53] : memref<2x8xi32, #tpu.memory_space<smem>>
    %52 = arith.index_cast %51 : i32 to index
    %c0_54 = arith.constant 0 : index
    %53 = vector.load %arg13[%52, %c0_54] : memref<32x128xf32, #tpu.memory_space<vmem>>, vector<1x128xf32>
    %c11 = arith.constant 11 : index
    %c0_55 = arith.constant 0 : index
    %54 = vector.load %arg14[%c11, %c0_55] : memref<16x128xf32, #tpu.memory_space<vmem>>, vector<1x128xf32>
    tpu.vector_store %arg14[%c11, %c0_55], %53 {strides = array<i32>} : memref<16x128xf32, #tpu.memory_space<vmem>>, vector<1x128xf32>,
    %c0_56 = arith.constant 0 : index
    %c6_57 = arith.constant 6 : index
    %55 = memref.load %arg1[%c0_56, %c6_57] : memref<2x8xi32, #tpu.memory_space<smem>>
    %56 = arith.index_cast %55 : i32 to index
    %c0_58 = arith.constant 0 : index
    %57 = vector.load %arg13[%56, %c0_58] : memref<32x128xf32, #tpu.memory_space<vmem>>, vector<1x128xf32>
    %c12 = arith.constant 12 : index
    %c0_59 = arith.constant 0 : index
    %58 = vector.load %arg14[%c12, %c0_59] : memref<16x128xf32, #tpu.memory_space<vmem>>, vector<1x128xf32>
    tpu.vector_store %arg14[%c12, %c0_59], %57 {strides = array<i32>} : memref<16x128xf32, #tpu.memory_space<vmem>>, vector<1x128xf32>,
    %c1_60 = arith.constant 1 : index
    %c6_61 = arith.constant 6 : index
    %59 = memref.load %arg1[%c1_60, %c6_61] : memref<2x8xi32, #tpu.memory_space<smem>>
    %60 = arith.index_cast %59 : i32 to index
    %c0_62 = arith.constant 0 : index
    %61 = vector.load %arg13[%60, %c0_62] : memref<32x128xf32, #tpu.memory_space<vmem>>, vector<1x128xf32>
    %c13 = arith.constant 13 : index
    %c0_63 = arith.constant 0 : index
    %62 = vector.load %arg14[%c13, %c0_63] : memref<16x128xf32, #tpu.memory_space<vmem>>, vector<1x128xf32>
    tpu.vector_store %arg14[%c13, %c0_63], %61 {strides = array<i32>} : memref<16x128xf32, #tpu.memory_space<vmem>>, vector<1x128xf32>,
    %c0_64 = arith.constant 0 : index
    %c7_65 = arith.constant 7 : index
    %63 = memref.load %arg1[%c0_64, %c7_65] : memref<2x8xi32, #tpu.memory_space<smem>>
    %64 = arith.index_cast %63 : i32 to index
    %c0_66 = arith.constant 0 : index
    %65 = vector.load %arg13[%64, %c0_66] : memref<32x128xf32, #tpu.memory_space<vmem>>, vector<1x128xf32>
    %c14 = arith.constant 14 : index
    %c0_67 = arith.constant 0 : index
    %66 = vector.load %arg14[%c14, %c0_67] : memref<16x128xf32, #tpu.memory_space<vmem>>, vector<1x128xf32>
    tpu.vector_store %arg14[%c14, %c0_67], %65 {strides = array<i32>} : memref<16x128xf32, #tpu.memory_space<vmem>>, vector<1x128xf32>,
    %c1_68 = arith.constant 1 : index
    %c7_69 = arith.constant 7 : index
    %67 = memref.load %arg1[%c1_68, %c7_69] : memref<2x8xi32, #tpu.memory_space<smem>>
    %68 = arith.index_cast %67 : i32 to index
    %c0_70 = arith.constant 0 : index
    %69 = vector.load %arg13[%68, %c0_70] : memref<32x128xf32, #tpu.memory_space<vmem>>, vector<1x128xf32>
    %c15 = arith.constant 15 : index
    %c0_71 = arith.constant 0 : index
    %70 = vector.load %arg14[%c15, %c0_71] : memref<16x128xf32, #tpu.memory_space<vmem>>, vector<1x128xf32>
    tpu.vector_store %arg14[%c15, %c0_71], %69 {strides = array<i32>} : memref<16x128xf32, #tpu.memory_space<vmem>>, vector<1x128xf32>,
    %c0_72 = arith.constant 0 : index
    %c0_73 = arith.constant 0 : index
    %71 = vector.load %arg6[%c0_72, %c0_73] : memref<32x128xf32, #tpu.memory_space<vmem>>, vector<32x128xf32>
    %c0_74 = arith.constant 0 : index
    %c0_75 = arith.constant 0 : index
    %72 = vector.load %arg2[%c0_74, %c0_75] : memref<2x32xf32, #tpu.memory_space<vmem>>, vector<2x32xf32>
    %c0_76 = arith.constant 0 : index
    %c0_77 = arith.constant 0 : index
    %73 = vector.load %arg3[%c0_76, %c0_77] : memref<2x32xf32, #tpu.memory_space<vmem>>, vector<2x32xf32>
    %c0_78 = arith.constant 0 : index
    %c0_79 = arith.constant 0 : index
    %74 = vector.load %arg14[%c0_78, %c0_79] : memref<16x128xf32, #tpu.memory_space<vmem>>, vector<2x128xf32>
    %cst_80 = arith.constant dense<0.000000e+00> : vector<2x128xf32>
    %75 = tpu.matmul %72, %71, %cst_80 {dimension_numbers = #tpu.dot_dimension_numbers<[1], [0], [0], [1], [0, 0, 1, 1], [], []>} : vector<2x32xf32>, vector<32x128xf32>, vector<2x128xf32> -> vector<2x128xf32>
    %76 = arith.addf %74, %75 : vector<2x128xf32>
    %77 = arith.negf %76 : vector<2x128xf32>
    %78 = math.exp %77 : vector<2x128xf32>
    %cst_81 = arith.constant 1.000000e+00 : f32
    %79 = vector.broadcast %cst_81 : f32 to vector<2x128xf32>
    %80 = arith.addf %79, %78 : vector<2x128xf32>
    %81 = arith.divf %79, %80 : vector<2x128xf32>
    %82 = math.tanh %76 : vector<2x128xf32>
    %83 = vector.extract_strided_slice %81 {offsets = [0, 0], sizes = [2, 32], strides = [1, 1]} : vector<2x128xf32> to vector<2x32xf32>
    %84 = vector.extract_strided_slice %81 {offsets = [0, 32], sizes = [2, 32], strides = [1, 1]} : vector<2x128xf32> to vector<2x32xf32>
    %85 = vector.extract_strided_slice %82 {offsets = [0, 64], sizes = [2, 32], strides = [1, 1]} : vector<2x128xf32> to vector<2x32xf32>
    %86 = vector.extract_strided_slice %81 {offsets = [0, 96], sizes = [2, 32], strides = [1, 1]} : vector<2x128xf32> to vector<2x32xf32>
    %87 = arith.mulf %84, %73 : vector<2x32xf32>
    %88 = arith.mulf %83, %85 : vector<2x32xf32>
    %89 = arith.addf %87, %88 : vector<2x32xf32>
    %90 = math.tanh %89 : vector<2x32xf32>
    %91 = arith.mulf %86, %90 : vector<2x32xf32>
    %c0_82 = arith.constant 0 : index
    %c0_83 = arith.constant 0 : index
    %92 = vector.load %arg15[%c0_82, %c0_83] : memref<16x32xf32, #tpu.memory_space<vmem>>, vector<2x32xf32>
    tpu.vector_store %arg15[%c0_82, %c0_83], %91 {strides = array<i32>} : memref<16x32xf32, #tpu.memory_space<vmem>>, vector<2x32xf32>,
    %c2_84 = arith.constant 2 : index
    %c0_85 = arith.constant 0 : index
    %93 = vector.load %arg14[%c2_84, %c0_85] : memref<16x128xf32, #tpu.memory_space<vmem>>, vector<2x128xf32>
    %cst_86 = arith.constant dense<0.000000e+00> : vector<2x128xf32>
    %94 = tpu.matmul %91, %71, %cst_86 {dimension_numbers = #tpu.dot_dimension_numbers<[1], [0], [0], [1], [0, 0, 1, 1], [], []>} : vector<2x32xf32>, vector<32x128xf32>, vector<2x128xf32> -> vector<2x128xf32>
    %95 = arith.addf %93, %94 : vector<2x128xf32>
    %96 = arith.negf %95 : vector<2x128xf32>
    %97 = math.exp %96 : vector<2x128xf32>
    %cst_87 = arith.constant 1.000000e+00 : f32
    %98 = vector.broadcast %cst_87 : f32 to vector<2x128xf32>
    %99 = arith.addf %98, %97 : vector<2x128xf32>
    %100 = arith.divf %98, %99 : vector<2x128xf32>
    %101 = math.tanh %95 : vector<2x128xf32>
    %102 = vector.extract_strided_slice %100 {offsets = [0, 0], sizes = [2, 32], strides = [1, 1]} : vector<2x128xf32> to vector<2x32xf32>
    %103 = vector.extract_strided_slice %100 {offsets = [0, 32], sizes = [2, 32], strides = [1, 1]} : vector<2x128xf32> to vector<2x32xf32>
    %104 = vector.extract_strided_slice %101 {offsets = [0, 64], sizes = [2, 32], strides = [1, 1]} : vector<2x128xf32> to vector<2x32xf32>
    %105 = vector.extract_strided_slice %100 {offsets = [0, 96], sizes = [2, 32], strides = [1, 1]} : vector<2x128xf32> to vector<2x32xf32>
    %106 = arith.mulf %103, %89 : vector<2x32xf32>
    %107 = arith.mulf %102, %104 : vector<2x32xf32>
    %108 = arith.addf %106, %107 : vector<2x32xf32>
    %109 = math.tanh %108 : vector<2x32xf32>
    %110 = arith.mulf %105, %109 : vector<2x32xf32>
    %c2_88 = arith.constant 2 : index
    %c0_89 = arith.constant 0 : index
    %111 = vector.load %arg15[%c2_88, %c0_89] : memref<16x32xf32, #tpu.memory_space<vmem>>, vector<2x32xf32>
    tpu.vector_store %arg15[%c2_88, %c0_89], %110 {strides = array<i32>} : memref<16x32xf32, #tpu.memory_space<vmem>>, vector<2x32xf32>,
    %c4_90 = arith.constant 4 : index
    %c0_91 = arith.constant 0 : index
    %112 = vector.load %arg14[%c4_90, %c0_91] : memref<16x128xf32, #tpu.memory_space<vmem>>, vector<2x128xf32>
    %cst_92 = arith.constant dense<0.000000e+00> : vector<2x128xf32>
    %113 = tpu.matmul %110, %71, %cst_92 {dimension_numbers = #tpu.dot_dimension_numbers<[1], [0], [0], [1], [0, 0, 1, 1], [], []>} : vector<2x32xf32>, vector<32x128xf32>, vector<2x128xf32> -> vector<2x128xf32>
    %114 = arith.addf %112, %113 : vector<2x128xf32>
    %115 = arith.negf %114 : vector<2x128xf32>
    %116 = math.exp %115 : vector<2x128xf32>
    %cst_93 = arith.constant 1.000000e+00 : f32
    %117 = vector.broadcast %cst_93 : f32 to vector<2x128xf32>
    %118 = arith.addf %117, %116 : vector<2x128xf32>
    %119 = arith.divf %117, %118 : vector<2x128xf32>
    %120 = math.tanh %114 : vector<2x128xf32>
    %121 = vector.extract_strided_slice %119 {offsets = [0, 0], sizes = [2, 32], strides = [1, 1]} : vector<2x128xf32> to vector<2x32xf32>
    %122 = vector.extract_strided_slice %119 {offsets = [0, 32], sizes = [2, 32], strides = [1, 1]} : vector<2x128xf32> to vector<2x32xf32>
    %123 = vector.extract_strided_slice %120 {offsets = [0, 64], sizes = [2, 32], strides = [1, 1]} : vector<2x128xf32> to vector<2x32xf32>
    %124 = vector.extract_strided_slice %119 {offsets = [0, 96], sizes = [2, 32], strides = [1, 1]} : vector<2x128xf32> to vector<2x32xf32>
    %125 = arith.mulf %122, %108 : vector<2x32xf32>
    %126 = arith.mulf %121, %123 : vector<2x32xf32>
    %127 = arith.addf %125, %126 : vector<2x32xf32>
    %128 = math.tanh %127 : vector<2x32xf32>
    %129 = arith.mulf %124, %128 : vector<2x32xf32>
    %c4_94 = arith.constant 4 : index
    %c0_95 = arith.constant 0 : index
    %130 = vector.load %arg15[%c4_94, %c0_95] : memref<16x32xf32, #tpu.memory_space<vmem>>, vector<2x32xf32>
    tpu.vector_store %arg15[%c4_94, %c0_95], %129 {strides = array<i32>} : memref<16x32xf32, #tpu.memory_space<vmem>>, vector<2x32xf32>,
    %c6_96 = arith.constant 6 : index
    %c0_97 = arith.constant 0 : index
    %131 = vector.load %arg14[%c6_96, %c0_97] : memref<16x128xf32, #tpu.memory_space<vmem>>, vector<2x128xf32>
    %cst_98 = arith.constant dense<0.000000e+00> : vector<2x128xf32>
    %132 = tpu.matmul %129, %71, %cst_98 {dimension_numbers = #tpu.dot_dimension_numbers<[1], [0], [0], [1], [0, 0, 1, 1], [], []>} : vector<2x32xf32>, vector<32x128xf32>, vector<2x128xf32> -> vector<2x128xf32>
    %133 = arith.addf %131, %132 : vector<2x128xf32>
    %134 = arith.negf %133 : vector<2x128xf32>
    %135 = math.exp %134 : vector<2x128xf32>
    %cst_99 = arith.constant 1.000000e+00 : f32
    %136 = vector.broadcast %cst_99 : f32 to vector<2x128xf32>
    %137 = arith.addf %136, %135 : vector<2x128xf32>
    %138 = arith.divf %136, %137 : vector<2x128xf32>
    %139 = math.tanh %133 : vector<2x128xf32>
    %140 = vector.extract_strided_slice %138 {offsets = [0, 0], sizes = [2, 32], strides = [1, 1]} : vector<2x128xf32> to vector<2x32xf32>
    %141 = vector.extract_strided_slice %138 {offsets = [0, 32], sizes = [2, 32], strides = [1, 1]} : vector<2x128xf32> to vector<2x32xf32>
    %142 = vector.extract_strided_slice %139 {offsets = [0, 64], sizes = [2, 32], strides = [1, 1]} : vector<2x128xf32> to vector<2x32xf32>
    %143 = vector.extract_strided_slice %138 {offsets = [0, 96], sizes = [2, 32], strides = [1, 1]} : vector<2x128xf32> to vector<2x32xf32>
    %144 = arith.mulf %141, %127 : vector<2x32xf32>
    %145 = arith.mulf %140, %142 : vector<2x32xf32>
    %146 = arith.addf %144, %145 : vector<2x32xf32>
    %147 = math.tanh %146 : vector<2x32xf32>
    %148 = arith.mulf %143, %147 : vector<2x32xf32>
    %c6_100 = arith.constant 6 : index
    %c0_101 = arith.constant 0 : index
    %149 = vector.load %arg15[%c6_100, %c0_101] : memref<16x32xf32, #tpu.memory_space<vmem>>, vector<2x32xf32>
    tpu.vector_store %arg15[%c6_100, %c0_101], %148 {strides = array<i32>} : memref<16x32xf32, #tpu.memory_space<vmem>>, vector<2x32xf32>,
    %c8_102 = arith.constant 8 : index
    %c0_103 = arith.constant 0 : index
    %150 = vector.load %arg14[%c8_102, %c0_103] : memref<16x128xf32, #tpu.memory_space<vmem>>, vector<2x128xf32>
    %cst_104 = arith.constant dense<0.000000e+00> : vector<2x128xf32>
    %151 = tpu.matmul %148, %71, %cst_104 {dimension_numbers = #tpu.dot_dimension_numbers<[1], [0], [0], [1], [0, 0, 1, 1], [], []>} : vector<2x32xf32>, vector<32x128xf32>, vector<2x128xf32> -> vector<2x128xf32>
    %152 = arith.addf %150, %151 : vector<2x128xf32>
    %153 = arith.negf %152 : vector<2x128xf32>
    %154 = math.exp %153 : vector<2x128xf32>
    %cst_105 = arith.constant 1.000000e+00 : f32
    %155 = vector.broadcast %cst_105 : f32 to vector<2x128xf32>
    %156 = arith.addf %155, %154 : vector<2x128xf32>
    %157 = arith.divf %155, %156 : vector<2x128xf32>
    %158 = math.tanh %152 : vector<2x128xf32>
    %159 = vector.extract_strided_slice %157 {offsets = [0, 0], sizes = [2, 32], strides = [1, 1]} : vector<2x128xf32> to vector<2x32xf32>
    %160 = vector.extract_strided_slice %157 {offsets = [0, 32], sizes = [2, 32], strides = [1, 1]} : vector<2x128xf32> to vector<2x32xf32>
    %161 = vector.extract_strided_slice %158 {offsets = [0, 64], sizes = [2, 32], strides = [1, 1]} : vector<2x128xf32> to vector<2x32xf32>
    %162 = vector.extract_strided_slice %157 {offsets = [0, 96], sizes = [2, 32], strides = [1, 1]} : vector<2x128xf32> to vector<2x32xf32>
    %163 = arith.mulf %160, %146 : vector<2x32xf32>
    %164 = arith.mulf %159, %161 : vector<2x32xf32>
    %165 = arith.addf %163, %164 : vector<2x32xf32>
    %166 = math.tanh %165 : vector<2x32xf32>
    %167 = arith.mulf %162, %166 : vector<2x32xf32>
    %c8_106 = arith.constant 8 : index
    %c0_107 = arith.constant 0 : index
    %168 = vector.load %arg15[%c8_106, %c0_107] : memref<16x32xf32, #tpu.memory_space<vmem>>, vector<2x32xf32>
    tpu.vector_store %arg15[%c8_106, %c0_107], %167 {strides = array<i32>} : memref<16x32xf32, #tpu.memory_space<vmem>>, vector<2x32xf32>,
    %c10_108 = arith.constant 10 : index
    %c0_109 = arith.constant 0 : index
    %169 = vector.load %arg14[%c10_108, %c0_109] : memref<16x128xf32, #tpu.memory_space<vmem>>, vector<2x128xf32>
    %cst_110 = arith.constant dense<0.000000e+00> : vector<2x128xf32>
    %170 = tpu.matmul %167, %71, %cst_110 {dimension_numbers = #tpu.dot_dimension_numbers<[1], [0], [0], [1], [0, 0, 1, 1], [], []>} : vector<2x32xf32>, vector<32x128xf32>, vector<2x128xf32> -> vector<2x128xf32>
    %171 = arith.addf %169, %170 : vector<2x128xf32>
    %172 = arith.negf %171 : vector<2x128xf32>
    %173 = math.exp %172 : vector<2x128xf32>
    %cst_111 = arith.constant 1.000000e+00 : f32
    %174 = vector.broadcast %cst_111 : f32 to vector<2x128xf32>
    %175 = arith.addf %174, %173 : vector<2x128xf32>
    %176 = arith.divf %174, %175 : vector<2x128xf32>
    %177 = math.tanh %171 : vector<2x128xf32>
    %178 = vector.extract_strided_slice %176 {offsets = [0, 0], sizes = [2, 32], strides = [1, 1]} : vector<2x128xf32> to vector<2x32xf32>
    %179 = vector.extract_strided_slice %176 {offsets = [0, 32], sizes = [2, 32], strides = [1, 1]} : vector<2x128xf32> to vector<2x32xf32>
    %180 = vector.extract_strided_slice %177 {offsets = [0, 64], sizes = [2, 32], strides = [1, 1]} : vector<2x128xf32> to vector<2x32xf32>
    %181 = vector.extract_strided_slice %176 {offsets = [0, 96], sizes = [2, 32], strides = [1, 1]} : vector<2x128xf32> to vector<2x32xf32>
    %182 = arith.mulf %179, %165 : vector<2x32xf32>
    %183 = arith.mulf %178, %180 : vector<2x32xf32>
    %184 = arith.addf %182, %183 : vector<2x32xf32>
    %185 = math.tanh %184 : vector<2x32xf32>
    %186 = arith.mulf %181, %185 : vector<2x32xf32>
    %c10_112 = arith.constant 10 : index
    %c0_113 = arith.constant 0 : index
    %187 = vector.load %arg15[%c10_112, %c0_113] : memref<16x32xf32, #tpu.memory_space<vmem>>, vector<2x32xf32>
    tpu.vector_store %arg15[%c10_112, %c0_113], %186 {strides = array<i32>} : memref<16x32xf32, #tpu.memory_space<vmem>>, vector<2x32xf32>,
    %c12_114 = arith.constant 12 : index
    %c0_115 = arith.constant 0 : index
    %188 = vector.load %arg14[%c12_114, %c0_115] : memref<16x128xf32, #tpu.memory_space<vmem>>, vector<2x128xf32>
    %cst_116 = arith.constant dense<0.000000e+00> : vector<2x128xf32>
    %189 = tpu.matmul %186, %71, %cst_116 {dimension_numbers = #tpu.dot_dimension_numbers<[1], [0], [0], [1], [0, 0, 1, 1], [], []>} : vector<2x32xf32>, vector<32x128xf32>, vector<2x128xf32> -> vector<2x128xf32>
    %190 = arith.addf %188, %189 : vector<2x128xf32>
    %191 = arith.negf %190 : vector<2x128xf32>
    %192 = math.exp %191 : vector<2x128xf32>
    %cst_117 = arith.constant 1.000000e+00 : f32
    %193 = vector.broadcast %cst_117 : f32 to vector<2x128xf32>
    %194 = arith.addf %193, %192 : vector<2x128xf32>
    %195 = arith.divf %193, %194 : vector<2x128xf32>
    %196 = math.tanh %190 : vector<2x128xf32>
    %197 = vector.extract_strided_slice %195 {offsets = [0, 0], sizes = [2, 32], strides = [1, 1]} : vector<2x128xf32> to vector<2x32xf32>
    %198 = vector.extract_strided_slice %195 {offsets = [0, 32], sizes = [2, 32], strides = [1, 1]} : vector<2x128xf32> to vector<2x32xf32>
    %199 = vector.extract_strided_slice %196 {offsets = [0, 64], sizes = [2, 32], strides = [1, 1]} : vector<2x128xf32> to vector<2x32xf32>
    %200 = vector.extract_strided_slice %195 {offsets = [0, 96], sizes = [2, 32], strides = [1, 1]} : vector<2x128xf32> to vector<2x32xf32>
    %201 = arith.mulf %198, %184 : vector<2x32xf32>
    %202 = arith.mulf %197, %199 : vector<2x32xf32>
    %203 = arith.addf %201, %202 : vector<2x32xf32>
    %204 = math.tanh %203 : vector<2x32xf32>
    %205 = arith.mulf %200, %204 : vector<2x32xf32>
    %c12_118 = arith.constant 12 : index
    %c0_119 = arith.constant 0 : index
    %206 = vector.load %arg15[%c12_118, %c0_119] : memref<16x32xf32, #tpu.memory_space<vmem>>, vector<2x32xf32>
    tpu.vector_store %arg15[%c12_118, %c0_119], %205 {strides = array<i32>} : memref<16x32xf32, #tpu.memory_space<vmem>>, vector<2x32xf32>,
    %c14_120 = arith.constant 14 : index
    %c0_121 = arith.constant 0 : index
    %207 = vector.load %arg14[%c14_120, %c0_121] : memref<16x128xf32, #tpu.memory_space<vmem>>, vector<2x128xf32>
    %cst_122 = arith.constant dense<0.000000e+00> : vector<2x128xf32>
    %208 = tpu.matmul %205, %71, %cst_122 {dimension_numbers = #tpu.dot_dimension_numbers<[1], [0], [0], [1], [0, 0, 1, 1], [], []>} : vector<2x32xf32>, vector<32x128xf32>, vector<2x128xf32> -> vector<2x128xf32>
    %209 = arith.addf %207, %208 : vector<2x128xf32>
    %210 = arith.negf %209 : vector<2x128xf32>
    %211 = math.exp %210 : vector<2x128xf32>
    %cst_123 = arith.constant 1.000000e+00 : f32
    %212 = vector.broadcast %cst_123 : f32 to vector<2x128xf32>
    %213 = arith.addf %212, %211 : vector<2x128xf32>
    %214 = arith.divf %212, %213 : vector<2x128xf32>
    %215 = math.tanh %209 : vector<2x128xf32>
    %216 = vector.extract_strided_slice %214 {offsets = [0, 0], sizes = [2, 32], strides = [1, 1]} : vector<2x128xf32> to vector<2x32xf32>
    %217 = vector.extract_strided_slice %214 {offsets = [0, 32], sizes = [2, 32], strides = [1, 1]} : vector<2x128xf32> to vector<2x32xf32>
    %218 = vector.extract_strided_slice %215 {offsets = [0, 64], sizes = [2, 32], strides = [1, 1]} : vector<2x128xf32> to vector<2x32xf32>
    %219 = vector.extract_strided_slice %214 {offsets = [0, 96], sizes = [2, 32], strides = [1, 1]} : vector<2x128xf32> to vector<2x32xf32>
    %220 = arith.mulf %217, %203 : vector<2x32xf32>
    %221 = arith.mulf %216, %218 : vector<2x32xf32>
    %222 = arith.addf %220, %221 : vector<2x32xf32>
    %223 = math.tanh %222 : vector<2x32xf32>
    %224 = arith.mulf %219, %223 : vector<2x32xf32>
    %c14_124 = arith.constant 14 : index
    %c0_125 = arith.constant 0 : index
    %225 = vector.load %arg15[%c14_124, %c0_125] : memref<16x32xf32, #tpu.memory_space<vmem>>, vector<2x32xf32>
    tpu.vector_store %arg15[%c14_124, %c0_125], %224 {strides = array<i32>} : memref<16x32xf32, #tpu.memory_space<vmem>>, vector<2x32xf32>,
    %c0_126 = arith.constant 0 : index
    %c0_127 = arith.constant 0 : index
    %226 = vector.load %arg11[%c0_126, %c0_127] : memref<2x32xf32, #tpu.memory_space<vmem>>, vector<2x32xf32>
    tpu.vector_store %arg11[%c0_126, %c0_127], %224 {strides = array<i32>} : memref<2x32xf32, #tpu.memory_space<vmem>>, vector<2x32xf32>,
    %c0_128 = arith.constant 0 : index
    %c0_129 = arith.constant 0 : index
    %227 = vector.load %arg12[%c0_128, %c0_129] : memref<2x32xf32, #tpu.memory_space<vmem>>, vector<2x32xf32>
    tpu.vector_store %arg12[%c0_128, %c0_129], %222 {strides = array<i32>} : memref<2x32xf32, #tpu.memory_space<vmem>>, vector<2x32xf32>,
    %c0_130 = arith.constant 0 : index
    %c0_131 = arith.constant 0 : index
    %228 = vector.load %arg15[%c0_130, %c0_131] : memref<16x32xf32, #tpu.memory_space<vmem>>, vector<16x32xf32>
    %c0_132 = arith.constant 0 : index
    %c0_133 = arith.constant 0 : index
    %229 = vector.load %arg8[%c0_132, %c0_133] : memref<32x32xf32, #tpu.memory_space<vmem>>, vector<32x32xf32>
    %cst_134 = arith.constant dense<0.000000e+00> : vector<16x32xf32>
    %230 = tpu.matmul %228, %229, %cst_134 {dimension_numbers = #tpu.dot_dimension_numbers<[1], [0], [0], [1], [0, 0, 1, 1], [], []>} : vector<16x32xf32>, vector<32x32xf32>, vector<16x32xf32> -> vector<16x32xf32>
    %c0_135 = arith.constant 0 : index
    %c0_136 = arith.constant 0 : index
    %231 = vector.load %arg9[%c0_135, %c0_136] : memref<1x32xf32, #tpu.memory_space<vmem>>, vector<1x32xf32>
    %232 = vector.broadcast %231 : vector<1x32xf32> to vector<16x32xf32>
    %233 = arith.addf %230, %232 : vector<16x32xf32>
    %c0_137 = arith.constant 0 : index
    %c0_138 = arith.constant 0 : index
    %234 = vector.load %arg10[%c0_137, %c0_138] : memref<16x32xf32, #tpu.memory_space<vmem>>, vector<16x32xf32>
    tpu.vector_store %arg10[%c0_137, %c0_138], %233 {strides = array<i32>} : memref<16x32xf32, #tpu.memory_space<vmem>>, vector<16x32xf32>,
    return
  }
  func.func @transform_0(%arg0: i32, %arg1: memref<2x8xi32, #tpu.memory_space<smem>>) -> (i32, i32) {
    %c0_i32 = arith.constant 0 : i32
    %c0_i32_0 = arith.constant 0 : i32
    %c0_i32_1 = arith.constant 0 : i32
    return %c0_i32, %c0_i32_0 : i32, i32
  }
  func.func @transform_1(%arg0: i32, %arg1: memref<2x8xi32, #tpu.memory_space<smem>>) -> (i32, i32) {
    %c0_i32 = arith.constant 0 : i32
    %c0_i32_0 = arith.constant 0 : i32
    %c0_i32_1 = arith.constant 0 : i32
    return %c0_i32, %c0_i32_0 : i32, i32
  }
  func.func @transform_2(%arg0: i32, %arg1: memref<2x8xi32, #tpu.memory_space<smem>>) -> (i32, i32) {
    %c0_i32 = arith.constant 0 : i32
    %c0_i32_0 = arith.constant 0 : i32
    %c0_i32_1 = arith.constant 0 : i32
    return %c0_i32, %c0_i32_0 : i32, i32
  }
  func.func @transform_3(%arg0: i32, %arg1: memref<2x8xi32, #tpu.memory_space<smem>>) -> (i32, i32) {
    %c0_i32 = arith.constant 0 : i32
    %c0_i32_0 = arith.constant 0 : i32
    %c0_i32_1 = arith.constant 0 : i32
    return %c0_i32, %c0_i32_0 : i32, i32
  }
  func.func @transform_4(%arg0: i32, %arg1: memref<2x8xi32, #tpu.memory_space<smem>>) -> (i32, i32) {
    %c0_i32 = arith.constant 0 : i32
    %c0_i32_0 = arith.constant 0 : i32
    %c0_i32_1 = arith.constant 0 : i32
    return %c0_i32, %c0_i32_0 : i32, i32
  }
  func.func @transform_5(%arg0: i32, %arg1: memref<2x8xi32, #tpu.memory_space<smem>>) -> (i32, i32) {
    %c0_i32 = arith.constant 0 : i32
    %c0_i32_0 = arith.constant 0 : i32
    %c0_i32_1 = arith.constant 0 : i32
    return %c0_i32, %c0_i32_0 : i32, i32
  }
  func.func @transform_6(%arg0: i32, %arg1: memref<2x8xi32, #tpu.memory_space<smem>>) -> (i32, i32) {
    %c0_i32 = arith.constant 0 : i32
    %c0_i32_0 = arith.constant 0 : i32
    %c0_i32_1 = arith.constant 0 : i32
    return %c0_i32, %c0_i32_0 : i32, i32
  }
  func.func @transform_7(%arg0: i32, %arg1: memref<2x8xi32, #tpu.memory_space<smem>>) -> (i32, i32) {
    %c0_i32 = arith.constant 0 : i32
    %c0_i32_0 = arith.constant 0 : i32
    %c0_i32_1 = arith.constant 0 : i32
    return %c0_i32, %c0_i32_0 : i32, i32
  }
  func.func @transform_8(%arg0: i32, %arg1: memref<2x8xi32, #tpu.memory_space<smem>>) -> (i32, i32) {
    %c0_i32 = arith.constant 0 : i32
    %c0_i32_0 = arith.constant 0 : i32
    %c0_i32_1 = arith.constant 0 : i32
    return %c0_i32, %c0_i32_0 : i32, i32
  }
  func.func @transform_9(%arg0: i32, %arg1: memref<2x8xi32, #tpu.memory_space<smem>>) -> (i32, i32) {
    %c0_i32 = arith.constant 0 : i32
    %c0_i32_0 = arith.constant 0 : i32
    %c0_i32_1 = arith.constant 0 : i32
    return %c0_i32, %c0_i32_0 : i32, i32
  }
  func.func @transform_10(%arg0: i32, %arg1: memref<2x8xi32, #tpu.memory_space<smem>>) -> (i32, i32) {
    %c0_i32 = arith.constant 0 : i32
    %c0_i32_0 = arith.constant 0 : i32
    %c0_i32_1 = arith.constant 0 : i32
    return %c0_i32, %c0_i32_0 : i32, i32
  }
}

</mosaic_0001>

<bundles_post_ra>
// kernel: tpu_custom_call.1
= control target key start
LH: loop header
LB: loop body
LE: loop exit
PB: predicated region body
PF: predicated region fallthrough
CT: control target
= control target key end

     0   :  { %s1104_s20 = smov [#allocation6]   ;;  %s1368_s0 = inlined_call_operand.vmem [shape: s32[2,8], index: 0, kind: input, shape index: {}]   ;;  %s1369_s1 = inlined_call_operand.vmem [shape: f32[2,32], index: 1, kind: input, shape index: {}]   ;;  %s1370_s2 = inlined_call_operand.hbm [shape: f32[2,32], index: 2, kind: input, shape index: {}]   ;;  %s1371_s3 = inlined_call_operand.vmem [shape: f32[32,16], index: 3, kind: input, shape index: {}]   ;;  %s1372_s4 = inlined_call_operand.vmem [shape: f32[16,128], index: 4, kind: input, shape index: {}]   ;;  %s1373_s5 = inlined_call_operand.vmem [shape: f32[32,128], index: 5, kind: input, shape index: {}]   ;;  %s1374_s6 = inlined_call_operand.vmem [shape: f32[1,128], index: 6, kind: input, shape index: {}]   ;;  %s1375_s7 = inlined_call_operand.hbm [shape: f32[32,32], index: 7, kind: input, shape index: {}]   ;;  %s1376_s8 = inlined_call_operand.vmem [shape: f32[1,32], index: 8, kind: input, shape index: {}]   ;;  %s1377_s9 = inlined_call_operand.hbm [shape: f32[16,32], index: 9, kind: output, shape index: {0}]   ;;  %s1378_s10 = inlined_call_operand.hbm [shape: f32[2,32], index: 10, kind: output, shape index: {1}]   ;;  %s1379_s11 = inlined_call_operand.hbm [shape: f32[2,32], index: 11, kind: output, shape index: {2}]  }
   0x1   :  { %s18_s19 = sshll.u32 %s1368_s0, 4  ;;  %s19_s19 = int_to_ptr.vmem [resolvable:$true] %s18_s19 }
   0x2   :  { %21 = dma.vmem_to_smem %s19_s19, 32, %s1104_s20, [#allocation5] }
   0x3   :  { %1094 = dma.done.wait [#allocation5], 32 }
   0x4   :  { %1095 = vsyncadd [#allocation5], 4294967264 }
   0x5   :  { %24 = sfence }
   0x6   :  { %25 = vsyncpa [#allocation8], 0 }
   0x7   :  { %26 = vsyncpa [#allocation11], 0 }
   0x8   :  { %27 = vsyncpa [#allocation9], 0 }
   0x9   :  { %28 = vsyncpa [#allocation14], 0  ;;  %s36_s23 = sshll.u32 %s1370_s2, 4  ;;  %s1105_s24 = smov [#allocation7]   ;;  %s37_s23 = int_to_ptr.hbm [resolvable:$true] %s36_s23 }
   0xa   :  { %s38_s25 = sshll.u32 %s1105_s24, 4  ;;  %s54_s27 = sshll.u32 %s1375_s7, 4  ;;  %s39_s25 = int_to_ptr.vmem [resolvable:$true] %s38_s25  ;;  %s55_s27 = int_to_ptr.hbm [resolvable:$true] %s54_s27 }
   0xb   :  { %41 = dma.hbm_to_vmem [thread:$0]  %s37_s23, 32, %s39_s25, [#allocation8]  }
   0xc   :  { %s1106_s28 = smov [#allocation10]   ;;  %s1107_s30 = smov 128  }
   0xd   :  { %s56_s29 = sshll.u32 %s1106_s28, 4  ;;  %s1108_s12 = smov 8   ;;  %s57_s29 = int_to_ptr.vmem [resolvable:$true] %s56_s29 }
   0xe   :  { %62 = dma.hbm_to_vmem [thread:$0]  %s55_s27, 512, %s57_s29, [#allocation11], %s1107_s30, %s1107_s30, %s1108_s12  }
   0xf   :  { %1096 = dma.done.wait [#allocation8], 32  }
  0x10   :  { %1097 = vsyncadd [#allocation8], 4294967264 }
  0x11   :  { %1098 = dma.done.wait [#allocation11], 512  }
  0x12   :  { %1099 = vsyncadd [#allocation11], 4294966784  ;;  %v78_v0 = vld [vmem:[%s1372_s4 + $0x8] sm:$0xff]  ;;  %v77_v1 = vld [vmem:[%s1372_s4] sm:$0xff]  ;;  %vm83_vm0 = vcmask 130048   ;;  %vm200_vm1 = vcmask 261120  }
  0x13   :  { %110 = vmatpush.msra.mxu0 %v78_v0  ;;  %v73_v2 = vld [vmem:[%s1371_s3] sm:$0xff]  ;;  %v1199_v3 = vld [vmem:[%s1373_s5 + $0x18] sm:$0xff]  ;;  %v1204_v4 = vld [vmem:[%s1373_s5 + $0x10] sm:$0xff]  ;;  %s129_s13 = sld [smem:[#allocation6]]  ;;  %vm270_vm6 = vcmask 254976  }
  0x14   :  { %216 = vmatpush.msra.mxu1 %v1199_v3  ;;  %v1211_v5 = vld [vmem:[%s1373_s5 + $0x8] sm:$0xff]  ;;  %287 = vmatpush.msra.mxu2 %v1199_v3  ;;  %v1219_v6 = vld [vmem:[%s1373_s5] sm:$0xff]  ;;  %v75_v9 = vld [vmem:[%s1371_s3 + $0x10] sm:$0xff]  ;;  %s852_s7 = sld [smem:[#allocation6 + $0x80]] }
  0x15   :  { %111 = vmatpush.msra.mxu0 %v77_v1  ;;  %353 = vmatpush.msra.mxu3 %v1199_v3  ;;  %v197_v7 = vld [vmem:[%s1369_s1] sm:$0x3]  ;;  %v74_v8 = vld [vmem:[%s1371_s3 + $0x8] sm:$0xff]  ;;  %v76_v10 = vld [vmem:[%s1371_s3 + $0x18] sm:$0xff]  ;;  %s853_s14 = sld [smem:[#allocation6 + $0x1]] }
  0x16   :  { %848 = vmatmul.msk.f32.vlgmr.msra.gmra.mxu0 %vm83_vm0, %v73_v2  ;;  %217 = vmatpush.msra.mxu1 %v1204_v4  ;;  %v896_v11 = vld [vmem:[%s1374_s6] ss:$0 sm:$0xff]  ;;  %s854_s15 = sld [smem:[#allocation6 + $0x81]] }
  0x17   :  { %288 = vmatpush.msra.mxu2 %v1204_v4  ;;  %354 = vmatpush.msra.mxu3 %v1204_v4  ;;  %s855_s3 = sld [smem:[#allocation6 + $0x2]]  ;;  %v198_v40 = vld [vmem:[#allocation7] sm:$0x3] }
  0x18   :  { %218 = vmatpush.msra.mxu1 %v1211_v5  ;;  %s856_s16 = sld [smem:[#allocation6 + $0x82]] }
  0x19   :  { %289 = vmatpush.msra.mxu2 %v1211_v5  ;;  %355 = vmatpush.msra.mxu3 %v1211_v5  ;;  %s857_s17 = sld [smem:[#allocation6 + $0x3]]  ;;  %s130_s24 = scalar_lea.vmem [#allocation2], %s129_s13 }
  0x1a   :  { %219 = vmatpush.msra.mxu1 %v1219_v6  ;;  %s1264_s18 = sld [smem:[#allocation6 + $0x83]]  ;;  %s134_s25 = scalar_lea.vmem [#allocation2], %s852_s7 }
  0x1b   :  { %867 = vmatmul.msk.f32.vlgmr.msra.gmra.mxu1 %vm200_vm1, %v197_v7  ;;  %290 = vmatpush.msra.mxu2 %v1219_v6  ;;  %s1266_s6 = sld [smem:[#allocation6 + $0x4]]  ;;  %s138_s26 = scalar_lea.vmem [#allocation2], %s853_s14 }
  0x1c   :  { %356 = vmatpush.msra.mxu3 %v1219_v6  ;;  %419 = vmatpush.msrb.mxu1 %v1199_v3  ;;  %s1268_s19 = sld [smem:[#allocation6 + $0x84]]  ;;  %s142_s0 = scalar_lea.vmem [#allocation2], %s854_s15 }
  0x1d   :  { %485 = vmatpush.msrb.mxu2 %v1199_v3  ;;  %s1270_s20 = sld [smem:[#allocation6 + $0x5]]  ;;  %s146_s1 = scalar_lea.vmem [#allocation2], %s855_s3 }
  0x1e   :  { %849 = vmatmul.msk.f32.gmra.mxu0 %vm83_vm0, %v74_v8  ;;  %420 = vmatpush.msrb.mxu1 %v1204_v4  ;;  %s1272_s4 = sld [smem:[#allocation6 + $0x85]]  ;;  %s150_s27 = scalar_lea.vmem [#allocation2], %s856_s16 }
  0x1f   :  { %551 = vmatpush.msrb.mxu3 %v1199_v3  ;;  %486 = vmatpush.msrb.mxu2 %v1204_v4  ;;  %s1274_s21 = sld [smem:[#allocation6 + $0x6]]  ;;  %s154_s28 = scalar_lea.vmem [#allocation2], %s857_s17 }
  0x20   :  { %421 = vmatpush.msrb.mxu1 %v1211_v5  ;;  %s1276_s22 = sld [smem:[#allocation6 + $0x86]]  ;;  %s158_s29 = scalar_lea.vmem [#allocation2], %s1264_s18 }
  0x21   :  { %552 = vmatpush.msrb.mxu3 %v1204_v4  ;;  %487 = vmatpush.msrb.mxu2 %v1211_v5  ;;  %s1278_s23 = sld [smem:[#allocation6 + $0x7]]  ;;  %s162_s2 = scalar_lea.vmem [#allocation2], %s1266_s6 }
  0x22   :  { %422 = vmatpush.msrb.mxu1 %v1219_v6  ;;  %s1280_s5 = sld [smem:[#allocation6 + $0x87]]  ;;  %s166_s13 = scalar_lea.vmem [#allocation2], %s1268_s19 }
  0x23   :  { %553 = vmatpush.msrb.mxu3 %v1211_v5  ;;  %488 = vmatpush.msrb.mxu2 %v1219_v6  ;;  %s170_s7 = scalar_lea.vmem [#allocation2], %s1270_s20  ;;  %s1109_s18 = smov 64  }
  0x24   :  { %617 = vmatpush.msra.mxu1 %v1199_v3  ;;  %s174_s14 = scalar_lea.vmem [#allocation2], %s1272_s4  ;;  %s1110_s6 = smov 32  }
  0x25   :  { %554 = vmatpush.msrb.mxu3 %v1219_v6  ;;  %s178_s15 = scalar_lea.vmem [#allocation2], %s1274_s21 }
  0x26   :  { %850 = vmatmul.msk.f32.gmra.mxu0 %vm83_vm0, %v75_v9  ;;  %618 = vmatpush.msra.mxu1 %v1204_v4  ;;  %s182_s3 = scalar_lea.vmem [#allocation2], %s1276_s22  ;;  %s801_s22 = sshll.u32 %s1378_s10, 4  ;;  %s802_s22 = int_to_ptr.hbm [resolvable:$true] %s801_s22 }
  0x27   :  { %s186_s16 = scalar_lea.vmem [#allocation2], %s1278_s23  ;;  %s1112_s23 = smov [#allocation13]  }
  0x28   :  { %619 = vmatpush.msra.mxu1 %v1211_v5  ;;  %s190_s17 = scalar_lea.vmem [#allocation2], %s1280_s5  ;;  %s787_s10 = sshll.u32 %s1377_s9, 4  ;;  %s788_s10 = int_to_ptr.hbm [resolvable:$true] %s787_s10 }
  0x2a   :  { %620 = vmatpush.msra.mxu1 %v1219_v6 }
  0x2e   :  { %851 = vmatmul.msk.f32.gmra.mxu0 %vm83_vm0, %v76_v10 }
  0x93   :  { %v113_v12 = vpop.f32.mrf.mxu0 }
  0x94   :  { %v114_v13 = vadd.f32 %v896_v11, %v113_v12 }
  0x96   :  { %125 = vst [vmem:[#allocation2] sm:$0xff] %v114_v13 }
  0x98   :  { %v221_v29 = vpop.f32.mrf.mxu1 }
  0x9b   :  { %v116_v14 = vpop.f32.mrf.mxu0 }
  0x9c   :  { %v117_v15 = vadd.f32 %v896_v11, %v116_v14 }
  0x9e   :  { %126 = vst [vmem:[#allocation2 + $0x8] sm:$0xff] %v117_v15 }
  0xa3   :  { %v119_v16 = vpop.f32.mrf.mxu0 }
  0xa4   :  { %v120_v17 = vadd.f32 %v896_v11, %v119_v16 }
  0xa6   :  { %127 = vst [vmem:[#allocation2 + $0x10] sm:$0xff] %v120_v17 }
  0xab   :  { %v122_v18 = vpop.f32.mrf.mxu0 }
  0xac   :  { %v123_v19 = vadd.f32 %v896_v11, %v122_v18 }
  0xae   :  { %128 = vst [vmem:[#allocation2 + $0x18] sm:$0xff] %v123_v19 }
  0xb5   :  { %v131_v20 = vld [vmem:[%s130_s24] sm:$0x1]  ;;  %s799_s24 = sshll.u32 %s1112_s23, 4  ;;  %s800_s24 = int_to_ptr.vmem [resolvable:$true] %s799_s24 }
  0xb6   :  { %v135_v21 = vld [vmem:[%s134_s25] sm:$0x1]  ;;  %132 = vst [vmem:[#allocation3] sm:$0x1] %v131_v20 }
  0xb7   :  { %v139_v22 = vld [vmem:[%s138_s26] sm:$0x1]  ;;  %136 = vst [vmem:[#allocation3 + $0x1] sm:$0x1] %v135_v21 }
  0xb8   :  { %v143_v23 = vld [vmem:[%s142_s0] sm:$0x1]  ;;  %140 = vst [vmem:[#allocation3 + $0x2] sm:$0x1] %v139_v22  ;;  %s812_s0 = sshll.u32 %s1379_s11, 4  ;;  %s813_s0 = int_to_ptr.hbm [resolvable:$true] %s812_s0 }
  0xb9   :  { %v147_v24 = vld [vmem:[%s146_s1] sm:$0x1]  ;;  %144 = vst [vmem:[#allocation3 + $0x3] sm:$0x1] %v143_v23  ;;  %s1113_s1 = smov [#allocation15]  }
  0xba   :  { %v151_v25 = vld [vmem:[%s150_s27] sm:$0x1]  ;;  %148 = vst [vmem:[#allocation3 + $0x4] sm:$0x1] %v147_v24  ;;  %s810_s5 = sshll.u32 %s1113_s1, 4  ;;  %s1114_s27 = smov [#allocation12]   ;;  %s811_s5 = int_to_ptr.vmem [resolvable:$true] %s810_s5 }
  0xbb   :  { %v155_v26 = vld [vmem:[%s154_s28] sm:$0x1]  ;;  %152 = vst [vmem:[#allocation3 + $0x5] sm:$0x1] %v151_v25  ;;  %s785_s28 = sshll.u32 %s1114_s27, 4  ;;  %s786_s28 = int_to_ptr.vmem [resolvable:$true] %s785_s28 }
  0xbc   :  { %v159_v27 = vld [vmem:[%s158_s29] sm:$0x1]  ;;  %156 = vst [vmem:[#allocation3 + $0x6] sm:$0x1] %v155_v26 }
  0xbd   :  { %v163_v28 = vld [vmem:[%s162_s2] sm:$0x1]  ;;  %160 = vst [vmem:[#allocation3 + $0x7] sm:$0x1] %v159_v27 }
  0xbe   :  { %v167_v30 = vld [vmem:[%s166_s13] sm:$0x1]  ;;  %164 = vst [vmem:[#allocation3 + $0x8] sm:$0x1] %v163_v28 }
  0xbf   :  { %v171_v31 = vld [vmem:[%s170_s7] sm:$0x1]  ;;  %168 = vst [vmem:[#allocation3 + $0x9] sm:$0x1] %v167_v30 }
  0xc0   :  { %v199_v32 = vld [vmem:[#allocation3] sm:$0x3]  ;;  %172 = vst [vmem:[#allocation3 + $0xa] sm:$0x1] %v171_v31  ;;  %v272_v0 = vld [vmem:[#allocation3 + $0x2] sm:$0x3] }
  0xc1   :  { %v175_v33 = vld [vmem:[%s174_s14] sm:$0x1]  ;;  %v224_v34 = vadd.f32 %v221_v29, %v199_v32 }
  0xc2   :  { %v179_v35 = vld [vmem:[%s178_s15] sm:$0x1]  ;;  %176 = vst [vmem:[#allocation3 + $0xb] sm:$0x1] %v175_v33  ;;  %v338_v26 = vld [vmem:[#allocation3 + $0x4] sm:$0x3] }
  0xc3   :  { %v183_v36 = vld [vmem:[%s182_s3] sm:$0x1]  ;;  %898 = vtanh.f32 %v224_v34  ;;  %180 = vst [vmem:[#allocation3 + $0xc] sm:$0x1] %v179_v35  ;;  %v868_v41 = vmul.f32 -1.442695, %v224_v34 }
  0xc4   :  { %v187_v37 = vld [vmem:[%s186_s16] sm:$0x1]  ;;  %184 = vst [vmem:[#allocation3 + $0xd] sm:$0x1] %v183_v36 }
  0xc5   :  { %v191_v38 = vld [vmem:[%s190_s17] sm:$0x1]  ;;  %188 = vst [vmem:[#allocation3 + $0xe] sm:$0x1] %v187_v37  ;;  %900 = vpow2.f32 %v868_v41 }
  0xc6   :  { %192 = vst [vmem:[#allocation3 + $0xf] sm:$0x1] %v191_v38 }
  0xc9   :  { %v899_v39 = vpop.eup %898 }
  0xca   :  { %251 = vrot.lane.b32.xlu0 %v899_v39, %s1109_s18 }
  0xcb   :  { %v901_v42 = vpop.eup %900 }
  0xcc   :  { %v228_v43 = vadd.f32 1.0, %v901_v42 }
  0xce   :  { %902 = vrcp.f32 %v228_v43  ;;  %v240_v49 = vand.u32 2147483648, %v228_v43  ;;  %vm234_vm3 = vweird.f32 %v228_v43  ;;  %v238_v50 = vand.u32 2147483647, %v228_v43 }
  0xd0   :  { %v241_v52 = vor.u32 1.1754944e-38, %v240_v49  ;;  %vm239_vm5 = vcmp.eq.f32.partialorder %v238_v50, 8.507059e+37 }
  0xd2   :  { %246 = vrot.lane.b32.xlu0 %v198_v40, %s1110_s6 }
  0xd4   :  { %v903_v44 = vpop.eup %902 }
  0xd5   :  { %v230_v45 = vmul.f32 %v903_v44, %v228_v43  ;;  %vm235_vm2 = vweird.f32 %v903_v44 }
  0xd6   :  { %vm236_vm4 = vmor %vm234_vm3, %vm235_vm2 }
  0xd7   :  { %v231_v46 = vsub.f32 1.0, %v230_v45 }
  0xd9   :  { %v232_v47 = vmul.f32 %v903_v44, %v231_v46 }
  0xdb   :  { %v233_v48 = vadd.f32 %v903_v44, %v232_v47 }
  0xdd   :  { %v237_v51 = vsel %vm236_vm4, %v903_v44, %v233_v48 }
  0xde   :  { %v242_v54 = vsel %vm239_vm5, %v241_v52, %v237_v51  ;;  %v404_v52 = vld [vmem:[#allocation3 + $0x6] sm:$0x3] }
 0x13c   :  { %v252_v53 = vpop.permute.xlu0 %251 }
 0x13d   :  { %v254_v55 = vmul.f32 %v252_v53, %v242_v54 }
 0x13f   :  { %256 = vrot.lane.b32.xlu1 %v254_v55, %s1110_s6 }
 0x144   :  { %v247_v56 = vpop.permute.xlu0 %246 }
 0x145   :  { %v249_v57 = vmul.f32 %v247_v56, %v242_v54 }
 0x1b1   :  { %v257_v58 = vpop.permute.xlu1 %256 }
 0x1b2   :  { %v259_v59 = vadd.f32 %v257_v58, %v249_v57 }
 0x1b4   :  { %904 = vtanh.f32 %v259_v59 }
 0x1ba   :  { %v905_v60 = vpop.eup %904 }
 0x1bb   :  { %262 = vrot.lane.b32.xlu1 %v905_v60, %s1109_s18 }
 0x22d   :  { %v263_v61 = vpop.permute.xlu1 %262 }
 0x22e   :  { %v265_v62 = vmul.f32 %v263_v61, %v242_v54 }
 0x230   :  { %267 = vrot.lane.b32.xlu2 %v265_v62, %s1110_s6 }
 0x28a   :  { %v268_v63 = vpop.permute.xlu2 %267 }
 0x28b   :  { %271 = vst.msk [vmem:[#allocation4] sm:$0x3] %vm270_vm6, %v268_v63  ;;  %869 = vmatmul.msk.f32.vlgmr.msra.gmra.mxu2 %vm200_vm1, %v268_v63 }
 0x28c   :  { %683 = vmatpush.msra.mxu2 %v1199_v3 }
 0x28e   :  { %684 = vmatpush.msra.mxu2 %v1204_v4 }
 0x290   :  { %685 = vmatpush.msra.mxu2 %v1211_v5 }
 0x292   :  { %686 = vmatpush.msra.mxu2 %v1219_v6 }
 0x30e   :  { %v292_v1 = vpop.f32.mrf.mxu2 }
 0x30f   :  { %v295_v2 = vadd.f32 %v292_v1, %v272_v0 }
 0x311   :  { %906 = vtanh.f32 %v295_v2  ;;  %v870_v8 = vmul.f32 -1.442695, %v295_v2 }
 0x313   :  { %908 = vpow2.f32 %v870_v8 }
 0x317   :  { %v907_v7 = vpop.eup %906 }
 0x318   :  { %318 = vrot.lane.b32.xlu2 %v907_v7, %s1109_s18 }
 0x319   :  { %v909_v9 = vpop.eup %908 }
 0x31a   :  { %v299_v10 = vadd.f32 1.0, %v909_v9 }
 0x31c   :  { %910 = vrcp.f32 %v299_v10  ;;  %v311_v5 = vand.u32 2147483648, %v299_v10  ;;  %vm305_vm8 = vweird.f32 %v299_v10  ;;  %v309_v6 = vand.u32 2147483647, %v299_v10 }
 0x31e   :  { %v312_v15 = vor.u32 1.1754944e-38, %v311_v5  ;;  %vm310_vm10 = vcmp.eq.f32.partialorder %v309_v6, 8.507059e+37 }
 0x322   :  { %v911_v11 = vpop.eup %910 }
 0x323   :  { %v301_v3 = vmul.f32 %v911_v11, %v299_v10  ;;  %vm306_vm7 = vweird.f32 %v911_v11 }
 0x324   :  { %vm307_vm9 = vmor %vm305_vm8, %vm306_vm7 }
 0x325   :  { %v302_v12 = vsub.f32 1.0, %v301_v3 }
 0x327   :  { %v303_v4 = vmul.f32 %v911_v11, %v302_v12 }
 0x329   :  { %v304_v13 = vadd.f32 %v911_v11, %v303_v4 }
 0x32b   :  { %v308_v14 = vsel %vm307_vm9, %v911_v11, %v304_v13 }
 0x32c   :  { %v313_v17 = vsel %vm310_vm10, %v312_v15, %v308_v14  ;;  %v470_v14 = vld [vmem:[#allocation3 + $0x8] sm:$0x3] }
 0x32d   :  { %v316_v19 = vmul.f32 %v313_v17, %v259_v59 }
 0x372   :  { %v319_v16 = vpop.permute.xlu2 %318 }
 0x373   :  { %v321_v18 = vmul.f32 %v319_v16, %v313_v17 }
 0x375   :  { %323 = vrot.lane.b32.xlu0 %v321_v18, %s1110_s6 }
 0x3e7   :  { %v324_v20 = vpop.permute.xlu0 %323 }
 0x3e8   :  { %v326_v21 = vadd.f32 %v324_v20, %v316_v19 }
 0x3ea   :  { %912 = vtanh.f32 %v326_v21 }
 0x3f0   :  { %v913_v22 = vpop.eup %912 }
 0x3f1   :  { %329 = vrot.lane.b32.xlu1 %v913_v22, %s1109_s18 }
 0x463   :  { %v330_v23 = vpop.permute.xlu1 %329 }
 0x464   :  { %v332_v24 = vmul.f32 %v330_v23, %v313_v17 }
 0x466   :  { %334 = vrot.lane.b32.xlu2 %v332_v24, %s1110_s6 }
 0x4c0   :  { %v335_v25 = vpop.permute.xlu2 %334 }
 0x4c1   :  { %337 = vst.msk [vmem:[#allocation4 + $0x2] sm:$0x3] %vm270_vm6, %v335_v25  ;;  %871 = vmatmul.msk.f32.vlgmr.msra.gmra.mxu3 %vm200_vm1, %v335_v25 }
 0x544   :  { %v358_v27 = vpop.f32.mrf.mxu3 }
 0x545   :  { %v361_v28 = vadd.f32 %v358_v27, %v338_v26 }
 0x547   :  { %914 = vtanh.f32 %v361_v28  ;;  %v872_v30 = vmul.f32 -1.442695, %v361_v28 }
 0x549   :  { %916 = vpow2.f32 %v872_v30 }
 0x54d   :  { %v915_v29 = vpop.eup %914 }
 0x54e   :  { %384 = vrot.lane.b32.xlu0 %v915_v29, %s1109_s18 }
 0x54f   :  { %v917_v31 = vpop.eup %916 }
 0x550   :  { %v365_v32 = vadd.f32 1.0, %v917_v31 }
 0x552   :  { %918 = vrcp.f32 %v365_v32  ;;  %v377_v38 = vand.u32 2147483648, %v365_v32  ;;  %vm371_vm12 = vweird.f32 %v365_v32  ;;  %v375_v39 = vand.u32 2147483647, %v365_v32 }
 0x554   :  { %v378_v41 = vor.u32 1.1754944e-38, %v377_v38  ;;  %vm376_vm14 = vcmp.eq.f32.partialorder %v375_v39, 8.507059e+37  ;;  %v745_v39 = vld [vmem:[#allocation10 + $0x18] sm:$0xff] }
 0x555   :  { %768 = vmatpush.msra.mxu3 %v745_v39 }
 0x558   :  { %v919_v33 = vpop.eup %918 }
 0x559   :  { %v367_v34 = vmul.f32 %v919_v33, %v365_v32  ;;  %vm372_vm11 = vweird.f32 %v919_v33 }
 0x55a   :  { %vm373_vm13 = vmor %vm371_vm12, %vm372_vm11 }
 0x55b   :  { %v368_v35 = vsub.f32 1.0, %v367_v34 }
 0x55d   :  { %v369_v36 = vmul.f32 %v919_v33, %v368_v35 }
 0x55f   :  { %v370_v37 = vadd.f32 %v919_v33, %v369_v36 }
 0x561   :  { %v374_v40 = vsel %vm373_vm13, %v919_v33, %v370_v37 }
 0x562   :  { %v379_v43 = vsel %vm376_vm14, %v378_v41, %v374_v40  ;;  %v744_v40 = vld [vmem:[#allocation10 + $0x10] sm:$0xff]  ;;  %v743_v41 = vld [vmem:[#allocation10 + $0x8] sm:$0xff] }
 0x563   :  { %v382_v45 = vmul.f32 %v379_v43, %v326_v21  ;;  %769 = vmatpush.msra.mxu3 %v744_v40 }
 0x565   :  { %770 = vmatpush.msra.mxu3 %v743_v41 }
 0x5c0   :  { %v385_v42 = vpop.permute.xlu0 %384 }
 0x5c1   :  { %v387_v44 = vmul.f32 %v385_v42, %v379_v43  ;;  %v742_v42 = vld [vmem:[#allocation10] sm:$0xff] }
 0x5c2   :  { %771 = vmatpush.msra.mxu3 %v742_v42 }
 0x5c3   :  { %389 = vrot.lane.b32.xlu1 %v387_v44, %s1110_s6 }
 0x635   :  { %v390_v46 = vpop.permute.xlu1 %389 }
 0x636   :  { %v392_v47 = vadd.f32 %v390_v46, %v382_v45  ;;  %v536_v45 = vld [vmem:[#allocation3 + $0xa] sm:$0x3] }
 0x638   :  { %920 = vtanh.f32 %v392_v47 }
 0x63e   :  { %v921_v48 = vpop.eup %920 }
 0x63f   :  { %395 = vrot.lane.b32.xlu2 %v921_v48, %s1109_s18  ;;  %v1330_v48 = vld [vmem:[%s1376_s8] ss:$0 sm:$0xff]  ;;  %s1111_s8 = smov 96  }
 0x699   :  { %v396_v49 = vpop.permute.xlu2 %395 }
 0x69a   :  { %v398_v50 = vmul.f32 %v396_v49, %v379_v43 }
 0x69c   :  { %400 = vrot.lane.b32.xlu0 %v398_v50, %s1110_s6 }
 0x70e   :  { %v401_v51 = vpop.permute.xlu0 %400 }
 0x70f   :  { %403 = vst.msk [vmem:[#allocation4 + $0x4] sm:$0x3] %vm270_vm6, %v401_v51  ;;  %873 = vmatmul.msk.f32.vlgmr.msrb.gmra.mxu1 %vm200_vm1, %v401_v51 }
 0x78c   :  { %v424_v53 = vpop.f32.mrf.mxu1 }
 0x78d   :  { %v427_v54 = vadd.f32 %v424_v53, %v404_v52 }
 0x78f   :  { %922 = vtanh.f32 %v427_v54  ;;  %v874_v56 = vmul.f32 -1.442695, %v427_v54 }
 0x791   :  { %924 = vpow2.f32 %v874_v56 }
 0x795   :  { %v923_v55 = vpop.eup %922 }
 0x796   :  { %450 = vrot.lane.b32.xlu1 %v923_v55, %s1109_s18 }
 0x797   :  { %v925_v57 = vpop.eup %924 }
 0x798   :  { %v431_v58 = vadd.f32 1.0, %v925_v57 }
 0x79a   :  { %926 = vrcp.f32 %v431_v58  ;;  %v443_v0 = vand.u32 2147483648, %v431_v58  ;;  %vm437_vm0 = vweird.f32 %v431_v58  ;;  %v441_v1 = vand.u32 2147483647, %v431_v58 }
 0x79c   :  { %v444_v7 = vor.u32 1.1754944e-38, %v443_v0  ;;  %vm442_vm3 = vcmp.eq.f32.partialorder %v441_v1, 8.507059e+37 }
 0x7a0   :  { %v927_v59 = vpop.eup %926 }
 0x7a1   :  { %v433_v60 = vmul.f32 %v927_v59, %v431_v58  ;;  %vm438_vm15 = vweird.f32 %v927_v59 }
 0x7a2   :  { %vm439_vm2 = vmor %vm437_vm0, %vm438_vm15 }
 0x7a3   :  { %v434_v61 = vsub.f32 1.0, %v433_v60 }
 0x7a5   :  { %v435_v62 = vmul.f32 %v927_v59, %v434_v61 }
 0x7a7   :  { %v436_v63 = vadd.f32 %v927_v59, %v435_v62 }
 0x7a9   :  { %v440_v2 = vsel %vm439_vm2, %v927_v59, %v436_v63 }
 0x7aa   :  { %v445_v9 = vsel %vm442_vm3, %v444_v7, %v440_v2 }
 0x7ab   :  { %v448_v11 = vmul.f32 %v445_v9, %v392_v47 }
 0x808   :  { %v451_v8 = vpop.permute.xlu1 %450 }
 0x809   :  { %v453_v10 = vmul.f32 %v451_v8, %v445_v9 }
 0x80b   :  { %455 = vrot.lane.b32.xlu2 %v453_v10, %s1110_s6 }
 0x865   :  { %v456_v3 = vpop.permute.xlu2 %455 }
 0x866   :  { %v458_v12 = vadd.f32 %v456_v3, %v448_v11 }
 0x868   :  { %928 = vtanh.f32 %v458_v12 }
 0x86e   :  { %v929_v4 = vpop.eup %928 }
 0x86f   :  { %461 = vrot.lane.b32.xlu0 %v929_v4, %s1109_s18  ;;  %v602_v4 = vld [vmem:[#allocation3 + $0xc] sm:$0x3] }
 0x8e1   :  { %v462_v13 = vpop.permute.xlu0 %461 }
 0x8e2   :  { %v464_v5 = vmul.f32 %v462_v13, %v445_v9 }
 0x8e4   :  { %466 = vrot.lane.b32.xlu1 %v464_v5, %s1110_s6 }
 0x956   :  { %v467_v6 = vpop.permute.xlu1 %466 }
 0x957   :  { %469 = vst.msk [vmem:[#allocation4 + $0x6] sm:$0x3] %vm270_vm6, %v467_v6  ;;  %875 = vmatmul.msk.f32.vlgmr.msrb.gmra.mxu2 %vm200_vm1, %v467_v6 }
 0x95e   :  { %v740_v44 = vld [vmem:[#allocation4] sm:$0xff] }
 0x9da   :  { %v490_v15 = vpop.f32.mrf.mxu2 }
 0x9db   :  { %v493_v16 = vadd.f32 %v490_v15, %v470_v14 }
 0x9dd   :  { %930 = vtanh.f32 %v493_v16  ;;  %v876_v18 = vmul.f32 -1.442695, %v493_v16 }
 0x9df   :  { %932 = vpow2.f32 %v876_v18 }
 0x9e3   :  { %v931_v17 = vpop.eup %930 }
 0x9e4   :  { %516 = vrot.lane.b32.xlu2 %v931_v17, %s1109_s18 }
 0x9e5   :  { %v933_v19 = vpop.eup %932 }
 0x9e6   :  { %v497_v20 = vadd.f32 1.0, %v933_v19 }
 0x9e8   :  { %934 = vrcp.f32 %v497_v20  ;;  %v509_v26 = vand.u32 2147483648, %v497_v20  ;;  %vm503_vm5 = vweird.f32 %v497_v20  ;;  %v507_v27 = vand.u32 2147483647, %v497_v20 }
 0x9ea   :  { %v510_v29 = vor.u32 1.1754944e-38, %v509_v26  ;;  %vm508_vm8 = vcmp.eq.f32.partialorder %v507_v27, 8.507059e+37 }
 0x9ee   :  { %v935_v21 = vpop.eup %934 }
 0x9ef   :  { %v499_v22 = vmul.f32 %v935_v21, %v497_v20  ;;  %vm504_vm4 = vweird.f32 %v935_v21 }
 0x9f0   :  { %vm505_vm7 = vmor %vm503_vm5, %vm504_vm4 }
 0x9f1   :  { %v500_v23 = vsub.f32 1.0, %v499_v22 }
 0x9f3   :  { %v501_v24 = vmul.f32 %v935_v21, %v500_v23 }
 0x9f5   :  { %v502_v25 = vadd.f32 %v935_v21, %v501_v24 }
 0x9f7   :  { %v506_v28 = vsel %vm505_vm7, %v935_v21, %v502_v25 }
 0x9f8   :  { %v511_v31 = vsel %vm508_vm8, %v510_v29, %v506_v28 }
 0x9f9   :  { %v514_v33 = vmul.f32 %v511_v31, %v458_v12 }
 0xa3e   :  { %v517_v30 = vpop.permute.xlu2 %516 }
 0xa3f   :  { %v519_v32 = vmul.f32 %v517_v30, %v511_v31 }
 0xa41   :  { %521 = vrot.lane.b32.xlu0 %v519_v32, %s1110_s6 }
 0xab3   :  { %v522_v34 = vpop.permute.xlu0 %521 }
 0xab4   :  { %v524_v35 = vadd.f32 %v522_v34, %v514_v33 }
 0xab6   :  { %936 = vtanh.f32 %v524_v35 }
 0xabc   :  { %v937_v36 = vpop.eup %936 }
 0xabd   :  { %527 = vrot.lane.b32.xlu1 %v937_v36, %s1109_s18  ;;  %v668_v36 = vld [vmem:[#allocation3 + $0xe] sm:$0x3] }
 0xb2f   :  { %v528_v37 = vpop.permute.xlu1 %527 }
 0xb30   :  { %v530_v38 = vmul.f32 %v528_v37, %v511_v31 }
 0xb32   :  { %532 = vrot.lane.b32.xlu2 %v530_v38, %s1110_s6 }
 0xb8c   :  { %v533_v43 = vpop.permute.xlu2 %532 }
 0xb8d   :  { %535 = vst.msk [vmem:[#allocation4 + $0x8] sm:$0x3] %vm270_vm6, %v533_v43  ;;  %877 = vmatmul.msk.f32.vlgmr.msrb.gmra.mxu3 %vm200_vm1, %v533_v43 }
 0xb95   :  { %883 = vmatmul.msk.f32.vlgmr.msra.gmra.mxu3 %vm200_vm1, %v740_v44 }
 0xc10   :  { %v556_v46 = vpop.f32.mrf.mxu3 }
 0xc11   :  { %v559_v47 = vadd.f32 %v556_v46, %v536_v45 }
 0xc13   :  { %938 = vtanh.f32 %v559_v47  ;;  %v878_v52 = vmul.f32 -1.442695, %v559_v47 }
 0xc15   :  { %940 = vpow2.f32 %v878_v52 }
 0xc18   :  { %v773_v49 = vpop.f32.mrf.mxu3 }
 0xc19   :  { %v939_v50 = vpop.eup %938  ;;  %v774_v51 = vadd.f32 %v1330_v48, %v773_v49 }
 0xc1a   :  { %582 = vrot.lane.b32.xlu0 %v939_v50, %s1109_s18 }
 0xc1b   :  { %779 = vst.msk [vmem:[#allocation12] sm:$0xff] %vm200_vm1, %v774_v51  ;;  %v941_v53 = vpop.eup %940 }
 0xc1c   :  { %v563_v54 = vadd.f32 1.0, %v941_v53 }
 0xc1e   :  { %942 = vrcp.f32 %v563_v54  ;;  %v575_v60 = vand.u32 2147483648, %v563_v54  ;;  %vm569_vm10 = vweird.f32 %v563_v54  ;;  %v573_v61 = vand.u32 2147483647, %v563_v54 }
 0xc20   :  { %v576_v63 = vor.u32 1.1754944e-38, %v575_v60  ;;  %vm574_vm12 = vcmp.eq.f32.partialorder %v573_v61, 8.507059e+37 }
 0xc24   :  { %v943_v55 = vpop.eup %942 }
 0xc25   :  { %v565_v56 = vmul.f32 %v943_v55, %v563_v54  ;;  %vm570_vm9 = vweird.f32 %v943_v55 }
 0xc26   :  { %vm571_vm11 = vmor %vm569_vm10, %vm570_vm9 }
 0xc27   :  { %v566_v57 = vsub.f32 1.0, %v565_v56 }
 0xc29   :  { %v567_v58 = vmul.f32 %v943_v55, %v566_v57 }
 0xc2b   :  { %v568_v59 = vadd.f32 %v943_v55, %v567_v58 }
 0xc2d   :  { %v572_v62 = vsel %vm571_vm11, %v943_v55, %v568_v59 }
 0xc2e   :  { %v577_v1 = vsel %vm574_vm12, %v576_v63, %v572_v62 }
 0xc2f   :  { %v580_v7 = vmul.f32 %v577_v1, %v524_v35 }
 0xc8c   :  { %v583_v0 = vpop.permute.xlu0 %582 }
 0xc8d   :  { %v585_v2 = vmul.f32 %v583_v0, %v577_v1 }
 0xc8f   :  { %587 = vrot.lane.b32.xlu1 %v585_v2, %s1110_s6 }
 0xd01   :  { %v588_v8 = vpop.permute.xlu1 %587 }
 0xd02   :  { %v590_v9 = vadd.f32 %v588_v8, %v580_v7 }
 0xd04   :  { %944 = vtanh.f32 %v590_v9 }
 0xd0a   :  { %v945_v10 = vpop.eup %944 }
 0xd0b   :  { %593 = vrot.lane.b32.xlu2 %v945_v10, %s1109_s18 }
 0xd65   :  { %v594_v11 = vpop.permute.xlu2 %593 }
 0xd66   :  { %v596_v3 = vmul.f32 %v594_v11, %v577_v1 }
 0xd68   :  { %598 = vrot.lane.b32.xlu0 %v596_v3, %s1110_s6 }
 0xdda   :  { %v599_v12 = vpop.permute.xlu0 %598 }
 0xddb   :  { %601 = vst.msk [vmem:[#allocation4 + $0xa] sm:$0x3] %vm270_vm6, %v599_v12  ;;  %879 = vmatmul.msk.f32.vlgmr.msra.gmra.mxu1 %vm200_vm1, %v599_v12 }
 0xe58   :  { %v622_v13 = vpop.f32.mrf.mxu1 }
 0xe59   :  { %v625_v5 = vadd.f32 %v622_v13, %v602_v4 }
 0xe5b   :  { %946 = vtanh.f32 %v625_v5  ;;  %v880_v14 = vmul.f32 -1.442695, %v625_v5 }
 0xe5d   :  { %948 = vpow2.f32 %v880_v14 }
 0xe61   :  { %v947_v6 = vpop.eup %946 }
 0xe62   :  { %648 = vrot.lane.b32.xlu1 %v947_v6, %s1109_s18 }
 0xe63   :  { %v949_v15 = vpop.eup %948 }
 0xe64   :  { %v629_v16 = vadd.f32 1.0, %v949_v15 }
 0xe66   :  { %950 = vrcp.f32 %v629_v16  ;;  %v641_v22 = vand.u32 2147483648, %v629_v16  ;;  %vm635_vm14 = vweird.f32 %v629_v16  ;;  %v639_v23 = vand.u32 2147483647, %v629_v16 }
 0xe68   :  { %v642_v25 = vor.u32 1.1754944e-38, %v641_v22  ;;  %vm640_vm0 = vcmp.eq.f32.partialorder %v639_v23, 8.507059e+37 }
 0xe6c   :  { %v951_v17 = vpop.eup %950 }
 0xe6d   :  { %v631_v18 = vmul.f32 %v951_v17, %v629_v16  ;;  %vm636_vm13 = vweird.f32 %v951_v17 }
 0xe6e   :  { %vm637_vm15 = vmor %vm635_vm14, %vm636_vm13 }
 0xe6f   :  { %v632_v19 = vsub.f32 1.0, %v631_v18 }
 0xe71   :  { %v633_v20 = vmul.f32 %v951_v17, %v632_v19 }
 0xe73   :  { %v634_v21 = vadd.f32 %v951_v17, %v633_v20 }
 0xe75   :  { %v638_v24 = vsel %vm637_vm15, %v951_v17, %v634_v21 }
 0xe76   :  { %v643_v27 = vsel %vm640_vm0, %v642_v25, %v638_v24 }
 0xe77   :  { %v646_v29 = vmul.f32 %v643_v27, %v590_v9 }
 0xed4   :  { %v649_v26 = vpop.permute.xlu1 %648 }
 0xed5   :  { %v651_v28 = vmul.f32 %v649_v26, %v643_v27 }
 0xed7   :  { %653 = vrot.lane.b32.xlu2 %v651_v28, %s1110_s6 }
 0xf31   :  { %v654_v30 = vpop.permute.xlu2 %653 }
 0xf32   :  { %v656_v31 = vadd.f32 %v654_v30, %v646_v29 }
 0xf34   :  { %952 = vtanh.f32 %v656_v31 }
 0xf3a   :  { %v953_v32 = vpop.eup %952 }
 0xf3b   :  { %659 = vrot.lane.b32.xlu0 %v953_v32, %s1109_s18 }
 0xfad   :  { %v660_v33 = vpop.permute.xlu0 %659 }
 0xfae   :  { %v662_v34 = vmul.f32 %v660_v33, %v643_v27 }
 0xfb0   :  { %664 = vrot.lane.b32.xlu1 %v662_v34, %s1110_s6 }
0x1022   :  { %v665_v35 = vpop.permute.xlu1 %664 }
0x1023   :  { %667 = vst.msk [vmem:[#allocation4 + $0xc] sm:$0x3] %vm270_vm6, %v665_v35  ;;  %881 = vmatmul.msk.f32.vlgmr.msra.gmra.mxu2 %vm200_vm1, %v665_v35 }
0x10a6   :  { %v688_v37 = vpop.f32.mrf.mxu2 }
0x10a7   :  { %v691_v38 = vadd.f32 %v688_v37, %v668_v36 }
0x10a9   :  { %954 = vtanh.f32 %v691_v38  ;;  %v882_v40 = vmul.f32 -1.442695, %v691_v38 }
0x10ab   :  { %956 = vpow2.f32 %v882_v40 }
0x10af   :  { %v955_v39 = vpop.eup %954 }
0x10b0   :  { %714 = vrot.lane.b32.xlu2 %v955_v39, %s1109_s18 }
0x10b1   :  { %v957_v41 = vpop.eup %956 }
0x10b2   :  { %v695_v42 = vadd.f32 1.0, %v957_v41 }
0x10b4   :  { %958 = vrcp.f32 %v695_v42  ;;  %v707_v49 = vand.u32 2147483648, %v695_v42  ;;  %vm701_vm3 = vweird.f32 %v695_v42  ;;  %v705_v50 = vand.u32 2147483647, %v695_v42 }
0x10b6   :  { %v708_v52 = vor.u32 1.1754944e-38, %v707_v49  ;;  %vm706_vm5 = vcmp.eq.f32.partialorder %v705_v50, 8.507059e+37 }
0x10ba   :  { %v959_v43 = vpop.eup %958 }
0x10bb   :  { %v697_v44 = vmul.f32 %v959_v43, %v695_v42  ;;  %vm702_vm2 = vweird.f32 %v959_v43 }
0x10bc   :  { %vm703_vm4 = vmor %vm701_vm3, %vm702_vm2 }
0x10bd   :  { %v698_v45 = vsub.f32 1.0, %v697_v44 }
0x10bf   :  { %v699_v46 = vmul.f32 %v959_v43, %v698_v45 }
0x10c1   :  { %v700_v47 = vadd.f32 %v959_v43, %v699_v46 }
0x10c3   :  { %v704_v51 = vsel %vm703_vm4, %v959_v43, %v700_v47 }
0x10c4   :  { %v709_v54 = vsel %vm706_vm5, %v708_v52, %v704_v51 }
0x10c5   :  { %v712_v56 = vmul.f32 %v709_v54, %v656_v31 }
0x110a   :  { %v715_v53 = vpop.permute.xlu2 %714 }
0x110b   :  { %v717_v55 = vmul.f32 %v715_v53, %v709_v54 }
0x110d   :  { %719 = vrot.lane.b32.xlu0 %v717_v55, %s1110_s6 }
0x117f   :  { %v720_v57 = vpop.permute.xlu0 %719 }
0x1180   :  { %v722_v58 = vadd.f32 %v720_v57, %v712_v56 }
0x1182   :  { %960 = vtanh.f32 %v722_v58  ;;  %736 = vrot.lane.b32.xlu0 %v722_v58, %s1111_s8 }
0x1188   :  { %v961_v59 = vpop.eup %960 }
0x1189   :  { %725 = vrot.lane.b32.xlu1 %v961_v59, %s1109_s18 }
0x11f4   :  { %v737_v60 = vpop.permute.xlu0 %736 }
0x11f5   :  { %739 = vst.msk [vmem:[#allocation15] sm:$0x3] %vm270_vm6, %v737_v60 }
0x11fb   :  { %v726_v61 = vpop.permute.xlu1 %725 }
0x11fc   :  { %v728_v62 = vmul.f32 %v726_v61, %v709_v54 }
0x11fe   :  { %730 = vrot.lane.b32.xlu2 %v728_v62, %s1110_s6 }
0x1258   :  { %v731_v63 = vpop.permute.xlu2 %730 }
0x1259   :  { %733 = vst.msk [vmem:[#allocation4 + $0xe] sm:$0x3] %vm270_vm6, %v731_v63 }
0x125a   :  { %734 = vst.msk [vmem:[#allocation13] sm:$0x3] %vm270_vm6, %v731_v63 }
0x125b   :  { %804 = dma.vmem_to_hbm [thread:$0]  %s800_s24, 32, %s802_s22, [#allocation14]  }
0x125c   :  { %815 = dma.vmem_to_hbm [thread:$0]  %s811_s5, 32, %s813_s0, [#allocation14]  }
0x1260   :  { %v741_v0 = vld [vmem:[#allocation4 + $0x8] sm:$0xff] }
0x1261   :  { %884 = vmatmul.msk.f32.gmra.mxu3 %vm200_vm1, %v741_v0 }
0x12e4   :  { %v776_v1 = vpop.f32.mrf.mxu3 }
0x12e5   :  { %v777_v2 = vadd.f32 %v1330_v48, %v776_v1 }
0x12e7   :  { %780 = vst.msk [vmem:[#allocation12 + $0x8] sm:$0xff] %vm200_vm1, %v777_v2 }
0x12e8   :  { %793 = dma.vmem_to_hbm [thread:$0]  %s786_s28, 256, %s788_s10, [#allocation9], %s1107_s30, %s1107_s30, %s1108_s12  }
0x12e9   :  { %1100 = dma.done.wait [#allocation9], 256  }
0x12ea   :  { %1101 = vsyncadd [#allocation9], 4294967040 }
0x12eb   :  { %1102 = dma.done.wait [#allocation14], 64  }
0x12ec   :  { %1103 = vsyncadd [#allocation14], 4294967232 }
0x12ed   :  { %828 = vsyncpa [#allocation8], 1 }
0x12ee   :  { %829 = vsyncpa [#allocation11], 1 }
0x12ef   :  { %830 = vsyncpa [#allocation9], 1 }
0x12f0   :  { %831 = vsyncpa [#allocation14], 1 }

</bundles_post_ra>
